<compile_context>
chip_gen: v6e
topology: v6e:2x2x1
jax: 0.10.0
libtpu: 0.0.40
codegen_flags: <defaults>
</compile_context>

<pallas_src>
import functools
import math

import jax
import jax.numpy as jnp
from jax.experimental import pallas as pl
from jax.experimental.pallas import tpu as pltpu

EPS = 1e-6
_ROWS_CAP = 4096          # max flattened rows per grid step fed to the MXU
_HAS_BUFFERED = hasattr(pl, "Buffered")


# ----------------------------- kernel body ---------------------------------

def _layer_norm(y, gamma, beta):
    mu = jnp.mean(y, axis=-1, keepdims=True)
    var = jnp.mean(jnp.square(y - mu), axis=-1, keepdims=True)
    return (y - mu) * jax.lax.rsqrt(var + EPS) * gamma + beta


def _recip(x, approx):
    if approx:
        return pl.reciprocal(x, approx=True)     # EUP slot, ~free
    return 1.0 / x


def _attention(q3, k3, v3, *, key_chunk, approx_recip, mm_dtype):
    """softmax(Q K^T) V ; scale already folded into Q. Inputs are mm_dtype."""
    bt, s, d = q3.shape
    if key_chunk is None or key_chunk >= s:
        e = jnp.einsum('bqd,bkd->bqk', q3, k3,
                       preferred_element_type=jnp.float32)       # (Bt, S, S)
        m = jnp.max(e, axis=-1, keepdims=True)
        p = jnp.exp(e - m)
        alpha = p * _recip(jnp.sum(p, axis=-1, keepdims=True), approx_recip)
        return jnp.einsum('bqk,bkd->bqd', alpha.astype(mm_dtype), v3,
                          preferred_element_type=jnp.float32)    # (Bt, S, D)

    # Flash-style online softmax over key chunks: peak score memory is
    # (Bt, S, key_chunk) instead of (Bt, S, S).
    m = jnp.full((bt, s, 1), -jnp.inf, jnp.float32)
    l = jnp.zeros((bt, s, 1), jnp.float32)
    acc = jnp.zeros((bt, s, d), jnp.float32)
    n_chunks = pl.cdiv(s, key_chunk)
    for ci in range(n_chunks):                       # static trip count
        lo = ci * key_chunk
        hi = min(lo + key_chunk, s)
        kc = k3[:, lo:hi, :]
        vc = v3[:, lo:hi, :]
        e = jnp.einsum('bqd,bkd->bqk', q3, kc,
                       preferred_element_type=jnp.float32)
        m_new = jnp.maximum(m, jnp.max(e, axis=-1, keepdims=True))
        a = jnp.exp(m - m_new)
        p = jnp.exp(e - m_new)
        l = a * l + jnp.sum(p, axis=-1, keepdims=True)
        acc = a * acc + jnp.einsum('bqk,bkd->bqd', p.astype(mm_dtype), vc,
                                   preferred_element_type=jnp.float32)
        m = m_new
    return acc * _recip(l, approx_recip)


def _vasnet_kernel(x_ref, wkqv_ref, wp_ref, wk1_ref, bk1_ref, wk2_ref,
                   gamma_ref, beta_ref, bk2_ref, o_ref, *,
                   key_chunk, approx_recip):
    bt, s, d = x_ref.shape
    rows = bt * s
    mm_dtype = wkqv_ref.dtype

    x2 = x_ref[...].astype(jnp.float32).reshape(rows, d)     # (Bt*S, D)
    xm = x2.astype(mm_dtype)

    # Fused K/Q/V projection: one wide MXU matmul, then lane-aligned slices.
    kqv = jnp.dot(xm, wkqv_ref[...],
                  preferred_element_type=jnp.float32)         # (Bt*S, 3D)
    k3 = kqv[:, 0:d].reshape(bt, s, d).astype(mm_dtype)
    q3 = kqv[:, d:2 * d].reshape(bt, s, d).astype(mm_dtype)   # scale pre-folded
    v3 = kqv[:, 2 * d:3 * d].reshape(bt, s, d).astype(mm_dtype)

    c3 = _attention(q3, k3, v3, key_chunk=key_chunk,
                    approx_recip=approx_recip, mm_dtype=mm_dtype)
    # dropout(alpha): identity in eval mode.

    c2 = jnp.dot(c3.reshape(rows, d).astype(mm_dtype), wp_ref[...],
                 preferred_element_type=jnp.float32)          # (Bt*S, D)
    y = c2 + x2
    # dropout(y): identity in eval mode.

    gamma = gamma_ref[...].astype(jnp.float32)                # (1, D)
    beta = beta_ref[...].astype(jnp.float32)                  # (1, D)
    y = _layer_norm(y, gamma, beta)

    y = jnp.dot(y.astype(mm_dtype), wk1_ref[...],
                preferred_element_type=jnp.float32) + bk1_ref[...].astype(jnp.float32)
    y = jnp.maximum(y, 0.0)
    # dropout(y): identity in eval mode.
    y = _layer_norm(y, gamma, beta)   # same nn.LayerNorm applied twice (spec).

    # k2 (out_features=1): VPU multiply + cross-lane reduce, written as one
    # lane-dense (1, Bt*S) row (avoids degenerate 1-column matmul / masked
    # last-dim-1 stores).
    wk2 = wk2_ref[...].astype(jnp.float32)                    # (1, D)
    logits = jnp.sum(y * wk2, axis=-1) + bk2_ref[0]           # (Bt*S,)
    o_ref[...] = jax.nn.sigmoid(logits).reshape(1, rows).astype(o_ref.dtype)


# --------------------------- tiling / budgeting -----------------------------

def _chip_profile():
    """(vmem_capacity_bytes, prefer_multi_step) derived from the chip."""
    vmem_cap = 128 * 1024 * 1024
    try:
        vmem_cap = int(pltpu.get_tpu_info().vmem_capacity_bytes)
    except Exception:
        pass
    multi_core = vmem_cap <= 64 * 1024 * 1024     # v7x-like: 2 TCs per chip
    try:
        kind = jax.devices()[0].device_kind.lower()
        if "v7" in kind:
            multi_core = True
    except Exception:
        pass
    return vmem_cap, multi_core


def _estimate_vmem(bt, s, d, kc, in_bytes, mm_bytes, weight_bytes,
                   weight_buffer_count):
    rows = bt * s
    x_slab = 2 * rows * d * in_bytes                       # double-buffered input
    xm = rows * d * mm_bytes
    kqv = rows * 3 * d * (4 + mm_bytes)                    # f32 result + casts
    scores = 3 * bt * s * kc * 4                           # e / p / alpha (f32)
    ctx = 2 * rows * d * 4                                 # c3(acc) + c2
    mlp = 3 * rows * d * 4                                 # y copies through LN/k1/LN
    out = 2 * rows * 4
    return x_slab + xm + kqv + scores + ctx + mlp + out + weight_bytes * weight_buffer_count


def _pick_batch_tile(b, s, d, *, in_bytes, mm_bytes, weight_bytes, key_chunk,
                     vmem_budget, prefer_multi_step, weight_buffer_count):
    kc = s if key_chunk is None else min(key_chunk, s)
    feasible = []
    for bt in range(1, b + 1):
        if b % bt:
            continue
        if bt * s > _ROWS_CAP:
            continue
        if _estimate_vmem(bt, s, d, kc, in_bytes, mm_bytes, weight_bytes,
                          weight_buffer_count) <= vmem_budget:
            feasible.append(bt)
    if not feasible:
        return 1
    best = max(feasible)
    if prefer_multi_step:
        # v7x: keep >=2 grid steps so both TensorCores get work.
        multi = [bt for bt in feasible if b // bt >= 2]
        if multi:
            best = max(multi)
    return best


# ------------------------------- wrappers -----------------------------------

def prepare_params(params, matmul_dtype=jnp.bfloat16, scale=None):
    """Fuse / pre-transpose torch-layout params into kernel-ready arrays.

    The softmax scale (default 1/sqrt(D)) is folded into the Q columns.
    """
    wk, wq, wv, wp, wk1, bk1, wk2, bk2, gamma, beta = params
    d = wk.shape[0]
    if scale is None:
        scale = 1.0 / math.sqrt(d)
    wq_scaled = jnp.asarray(wq, jnp.float32) * jnp.float32(scale)
    w_kqv = jnp.concatenate([wk.T, wq_scaled.T, wv.T], axis=1).astype(matmul_dtype)
    wp_t = jnp.asarray(wp.T, matmul_dtype)
    wk1_t = jnp.asarray(wk1.T, matmul_dtype)
    bk1_r = jnp.asarray(bk1, jnp.float32).reshape(1, d)
    wk2_r = jnp.asarray(wk2, jnp.float32).reshape(1, d)
    bk2_r = jnp.asarray(bk2, jnp.float32).reshape(1)
    gamma_r = jnp.asarray(gamma, jnp.float32).reshape(1, d)
    beta_r = jnp.asarray(beta, jnp.float32).reshape(1, d)
    return (w_kqv, wp_t, wk1_t, bk1_r, wk2_r, gamma_r, beta_r, bk2_r)


def _const_spec(shape, single_buffer):
    imap = lambda i: (0,) * len(shape)
    if single_buffer and _HAS_BUFFERED:
        return pl.BlockSpec(shape, imap, pipeline_mode=pl.Buffered(1))
    return pl.BlockSpec(shape, imap)


def vasnet_forward_bsd(x_bsd, prepared_params, *, batch_tile=None,
                       key_chunk=None, approx_softmax=True):
    """Batch-major entry point (preferred): (B, S, D) -> (B, S) sigmoid scores."""
    b, s, d = x_bsd.shape
    w_kqv, wp_t, wk1_t, bk1, wk2, gamma, beta, bk2 = prepared_params
    mm_dtype = jnp.dtype(w_kqv.dtype)
    mm_bytes = mm_dtype.itemsize
    in_bytes = jnp.dtype(x_bsd.dtype).itemsize

    # Chip-aware VMEM budgets.
    vmem_cap, prefer_multi = _chip_profile()
    vmem_limit = max(32 * 1024 * 1024,
                     min(vmem_cap - 16 * 1024 * 1024, 100 * 1024 * 1024))
    budget = int(vmem_limit * 0.85)

    # Auto key-chunking for long sequences bounds (Bt,S,S) score memory.
    if key_chunk is None and s > 1024:
        key_chunk = 512

    weight_bytes = ((w_kqv.size + wp_t.size + wk1_t.size) * mm_bytes
                    + (bk1.size + wk2.size + gamma.size + beta.size) * 4)
    weight_buffer_count = 1 if _HAS_BUFFERED else 2

    bt = batch_tile if batch_tile is not None else _pick_batch_tile(
        b, s, d, in_bytes=in_bytes, mm_bytes=mm_bytes,
        weight_bytes=weight_bytes, key_chunk=key_chunk, vmem_budget=budget,
        prefer_multi_step=prefer_multi, weight_buffer_count=weight_buffer_count)
    assert b % bt == 0, "batch tile must divide batch"
    rows = bt * s
    n_steps = b // bt

    kernel = functools.partial(_vasnet_kernel, key_chunk=key_chunk,
                               approx_recip=approx_softmax)

    def run(single_buffer_weights):
        cs = lambda shp: _const_spec(shp, single_buffer_weights)
        call = pl.pallas_call(
            kernel,
            out_shape=jax.ShapeDtypeStruct((n_steps, rows), jnp.float32),
            grid_spec=pltpu.PrefetchScalarGridSpec(
                num_scalar_prefetch=0,
                grid=(n_steps,),
                in_specs=[
                    pl.BlockSpec((bt, s, d), lambda i: (i, 0, 0)),      # x slab
                    cs((d, 3 * d)),                                     # [K|Qs|V]^T
                    cs((d, d)),                                         # W_proj^T
                    cs((d, d)),                                         # W_k1^T
                    cs((1, d)),                                         # b_k1
                    cs((1, d)),                                         # W_k2 row
                    cs((1, d)),                                         # LN gamma
                    cs((1, d)),                                         # LN beta
                    pl.BlockSpec(memory_space=pltpu.MemorySpace.SMEM),  # b_k2
                ],
                out_specs=pl.BlockSpec((1, rows), lambda i: (i, 0)),
            ),
            compiler_params=pltpu.CompilerParams(
                dimension_semantics=("parallel",),
                vmem_limit_bytes=vmem_limit,
            ),
        )
        return call(x_bsd, w_kqv, wp_t, wk1_t, bk1, wk2, gamma, beta, bk2)

    if _HAS_BUFFERED:
        try:
            out2d = run(True)
        except Exception:      # older jax / pipeline_mode unsupported
            out2d = run(False)
    else:
        out2d = run(False)

    return out2d.reshape(n_steps, bt, s).reshape(b, s)


def vasnet_forward(x_sbd, params, *, matmul_dtype=jnp.bfloat16,
                   batch_tile=None, key_chunk=None, approx_softmax=True):
    """PyTorch interface: x (seq_len, batch, D) -> (seq_len, batch, 1).

    Prefer `vasnet_forward_bsd` with pre-prepared params to skip the HBM
    transpose and the per-call weight fusion.
    """
    prepared = prepare_params(params, matmul_dtype)
    x_bsd = jnp.transpose(x_sbd, (1, 0, 2))
    out_bs = vasnet_forward_bsd(x_bsd, prepared, batch_tile=batch_tile,
                                key_chunk=key_chunk,
                                approx_softmax=approx_softmax)
    return jnp.transpose(out_bs, (1, 0))[:, :, None]


# ----------------------- pure-JAX reference + init -------------------------

def vasnet_reference(x_sbd, params):
    wk, wq, wv, wp, wk1, bk1, wk2, bk2, gamma, beta = params
    d = wk.shape[0]
    with jax.default_matmul_precision("highest"):
        x = jnp.transpose(x_sbd, (1, 0, 2))                 # (B, S, D)
        K = x @ wk.T
        Q = x @ wq.T
        V = x @ wv.T
        e = jnp.einsum('bqd,bkd->bqk', Q, K) * (1.0 / math.sqrt(d))
        alpha = jax.nn.softmax(e, axis=-1)
        c = jnp.einsum('bqk,bkd->bqd', alpha, V) @ wp.T
        y = c + x

        def ln(t):
            mu = jnp.mean(t, -1, keepdims=True)
            var = jnp.mean((t - mu) ** 2, -1, keepdims=True)
            return (t - mu) / jnp.sqrt(var + EPS) * gamma + beta

        y = ln(y)
        y = jnp.maximum(y @ wk1.T + bk1, 0.0)
        y = ln(y)
        y = jax.nn.sigmoid(y @ wk2.T + bk2)
    return jnp.transpose(y, (1, 0, 2))


def _xavier_uniform(key, shape, gain):
    fan_out, fan_in = shape[0], shape[1]
    bound = gain * math.sqrt(6.0 / (fan_in + fan_out))
    return jax.random.uniform(key, shape, jnp.float32, -bound, bound)


def init_params(key, D):
    """Torch-layout parameters (weights are (out_features, in_features))."""
    gain = math.sqrt(2.0)
    ks = jax.random.split(key, 6)
    wk = _xavier_uniform(ks[0], (D, D), gain)
    wq = _xavier_uniform(ks[1], (D, D), gain)
    wv = _xavier_uniform(ks[2], (D, D), gain)
    wp = _xavier_uniform(ks[3], (D, D), gain)
    wk1 = _xavier_uniform(ks[4], (D, D), gain)
    bk1 = jnp.full((D,), 0.1, jnp.float32)
    wk2 = _xavier_uniform(ks[5], (1, D), gain)
    bk2 = jnp.full((1,), 0.1, jnp.float32)
    gamma = jnp.ones((D,), jnp.float32)                  # shared LayerNorm weight
    beta = jnp.zeros((D,), jnp.float32)                  # shared LayerNorm bias
    return (wk, wq, wv, wp, wk1, bk1, wk2, bk2, gamma, beta)


if __name__ == "__main__":
    # Small shapes consistent with the module: seq_len=8, batch=2, input_size=128.
    S, B, D = 8, 2, 128
    key = jax.random.PRNGKey(0)
    kx, kp = jax.random.split(key)
    x = jax.random.normal(kx, (S, B, D), jnp.float32)
    params = init_params(kp, D)

    y_ref = vasnet_reference(x, params)

    # 1) Default path: bf16 MXU operands + approx EUP softmax reciprocal.
    y = vasnet_forward(x, params)
    jax.block_until_ready(y)
    assert y.shape == (S, B, 1)
    err = float(jnp.max(jnp.abs(y - y_ref)))
    assert err < 4e-2, f"bf16 path mismatch vs reference: {err}"

    # 2) Exact-f32 validation fallback.
    y32 = vasnet_forward(x, params, matmul_dtype=jnp.float32,
                         approx_softmax=False)
    jax.block_until_ready(y32)
    err32 = float(jnp.max(jnp.abs(y32 - y_ref)))
    assert err32 < 1e-2, f"f32 path mismatch vs reference: {err32}"

    # 3) Flash-style key-chunked softmax path (exercised with a tiny chunk).
    yc = vasnet_forward(x, params, key_chunk=4)
    jax.block_until_ready(yc)
    errc = float(jnp.max(jnp.abs(yc - y_ref)))
    assert errc < 4e-2, f"chunked path mismatch vs reference: {errc}"

    print("KERNEL_OK")
</pallas_src>

<mosaic_0001>
module attributes {stable_mosaic.version = 11 : i64} {
  func.func @_vasnet_kernel(%arg0: i32, %arg1: memref<2x8x128xf32, #tpu.memory_space<vmem>>, %arg2: memref<128x384xbf16, #tpu.memory_space<vmem>>, %arg3: memref<128x128xbf16, #tpu.memory_space<vmem>>, %arg4: memref<128x128xbf16, #tpu.memory_space<vmem>>, %arg5: memref<1x128xf32, #tpu.memory_space<vmem>>, %arg6: memref<1x128xf32, #tpu.memory_space<vmem>>, %arg7: memref<1x128xf32, #tpu.memory_space<vmem>>, %arg8: memref<1x128xf32, #tpu.memory_space<vmem>>, %arg9: memref<1xf32, #tpu.memory_space<smem>>, %arg10: memref<1x16xf32, #tpu.memory_space<vmem>>) attributes {dimension_semantics = [#tpu.dimension_semantics<parallel>], iteration_bounds = array<i64: 1>, scalar_prefetch = 0 : i64, scratch_operands = 0 : i64, tpu.core_type = #tpu.core_type<tc>, window_params = [{transform_indices = @transform_0, window_bounds = array<i64: 2, 8, 128>}, {pipeline_mode = #tpu.pipeline_mode<synchronous>, transform_indices = @transform_1, window_bounds = array<i64: 128, 384>}, {pipeline_mode = #tpu.pipeline_mode<synchronous>, transform_indices = @transform_2, window_bounds = array<i64: 128, 128>}, {pipeline_mode = #tpu.pipeline_mode<synchronous>, transform_indices = @transform_3, window_bounds = array<i64: 128, 128>}, {pipeline_mode = #tpu.pipeline_mode<synchronous>, transform_indices = @transform_4, window_bounds = array<i64: 1, 128>}, {pipeline_mode = #tpu.pipeline_mode<synchronous>, transform_indices = @transform_5, window_bounds = array<i64: 1, 128>}, {pipeline_mode = #tpu.pipeline_mode<synchronous>, transform_indices = @transform_6, window_bounds = array<i64: 1, 128>}, {pipeline_mode = #tpu.pipeline_mode<synchronous>, transform_indices = @transform_7, window_bounds = array<i64: 1, 128>}, {transform_indices = @transform_8, window_bounds = array<i64: 1>}, {transform_indices = @transform_9, window_bounds = array<i64: 1, 16>}]} {
    %c0 = arith.constant 0 : index
    %c0_0 = arith.constant 0 : index
    %c0_1 = arith.constant 0 : index
    %0 = vector.load %arg1[%c0, %c0_0, %c0_1] : memref<2x8x128xf32, #tpu.memory_space<vmem>>, vector<2x8x128xf32>
    %1 = vector.shape_cast %0 : vector<2x8x128xf32> to vector<16x128xf32>
    %2 = arith.truncf %1 : vector<16x128xf32> to vector<16x128xbf16>
    %c0_2 = arith.constant 0 : index
    %c0_3 = arith.constant 0 : index
    %3 = vector.load %arg2[%c0_2, %c0_3] : memref<128x384xbf16, #tpu.memory_space<vmem>>, vector<128x384xbf16>
    %cst = arith.constant dense<0.000000e+00> : vector<16x384xf32>
    %4 = tpu.matmul %2, %3, %cst {dimension_numbers = #tpu.dot_dimension_numbers<[1], [0], [0], [1], [0, 0, 1, 1], [], []>} : vector<16x128xbf16>, vector<128x384xbf16>, vector<16x384xf32> -> vector<16x384xf32>
    %5 = vector.extract_strided_slice %4 {offsets = [0, 0], sizes = [16, 128], strides = [1, 1]} : vector<16x384xf32> to vector<16x128xf32>
    %6 = vector.shape_cast %5 : vector<16x128xf32> to vector<2x8x128xf32>
    %7 = arith.truncf %6 : vector<2x8x128xf32> to vector<2x8x128xbf16>
    %8 = vector.extract_strided_slice %4 {offsets = [0, 128], sizes = [16, 128], strides = [1, 1]} : vector<16x384xf32> to vector<16x128xf32>
    %9 = vector.shape_cast %8 : vector<16x128xf32> to vector<2x8x128xf32>
    %10 = arith.truncf %9 : vector<2x8x128xf32> to vector<2x8x128xbf16>
    %11 = vector.extract_strided_slice %4 {offsets = [0, 256], sizes = [16, 128], strides = [1, 1]} : vector<16x384xf32> to vector<16x128xf32>
    %12 = vector.shape_cast %11 : vector<16x128xf32> to vector<2x8x128xf32>
    %13 = arith.truncf %12 : vector<2x8x128xf32> to vector<2x8x128xbf16>
    "tpu.trace_start"() <{level = 10 : i32, message = "bqd,bkd->bqk"}> : () -> ()
    %cst_4 = arith.constant dense<0.000000e+00> : vector<2x8x8xf32>
    %14 = tpu.matmul %10, %7, %cst_4 {dimension_numbers = #tpu.dot_dimension_numbers<[2], [2], [1], [1], [0, 0, 0, 1, 1, 1], [0], [0]>} : vector<2x8x128xbf16>, vector<2x8x128xbf16>, vector<2x8x8xf32> -> vector<2x8x8xf32>
    "tpu.trace_stop"() : () -> ()
    %cst_5 = arith.constant dense<0xFF800000> : vector<2x8xf32>
    %15 = vector.multi_reduction <maximumf>, %14, %cst_5 [2] : vector<2x8x8xf32> to vector<2x8xf32>
    %16 = vector.shape_cast %15 : vector<2x8xf32> to vector<2x8x1xf32>
    %17 = vector.broadcast %16 : vector<2x8x1xf32> to vector<2x8x8xf32>
    %18 = arith.subf %14, %17 : vector<2x8x8xf32>
    %19 = math.exp %18 : vector<2x8x8xf32>
    %cst_6 = arith.constant dense<0.000000e+00> : vector<2x8xf32>
    %20 = vector.multi_reduction <add>, %19, %cst_6 [2] : vector<2x8x8xf32> to vector<2x8xf32>
    %21 = vector.shape_cast %20 : vector<2x8xf32> to vector<2x8x1xf32>
    %22 = tpu.reciprocal %21 {approx = true} : vector<2x8x1xf32> -> vector<2x8x1xf32>
    %23 = vector.broadcast %22 : vector<2x8x1xf32> to vector<2x8x8xf32>
    %24 = arith.mulf %19, %23 : vector<2x8x8xf32>
    %25 = arith.truncf %24 : vector<2x8x8xf32> to vector<2x8x8xbf16>
    "tpu.trace_start"() <{level = 10 : i32, message = "bqk,bkd->bqd"}> : () -> ()
    %cst_7 = arith.constant dense<0.000000e+00> : vector<2x8x128xf32>
    %26 = tpu.matmul %25, %13, %cst_7 {dimension_numbers = #tpu.dot_dimension_numbers<[2], [1], [1], [2], [0, 0, 0, 1, 1, 2], [0], [0]>} : vector<2x8x8xbf16>, vector<2x8x128xbf16>, vector<2x8x128xf32> -> vector<2x8x128xf32>
    "tpu.trace_stop"() : () -> ()
    %27 = vector.shape_cast %26 : vector<2x8x128xf32> to vector<16x128xf32>
    %28 = arith.truncf %27 : vector<16x128xf32> to vector<16x128xbf16>
    %c0_8 = arith.constant 0 : index
    %c0_9 = arith.constant 0 : index
    %29 = vector.load %arg3[%c0_8, %c0_9] : memref<128x128xbf16, #tpu.memory_space<vmem>>, vector<128x128xbf16>
    %cst_10 = arith.constant dense<0.000000e+00> : vector<16x128xf32>
    %30 = tpu.matmul %28, %29, %cst_10 {dimension_numbers = #tpu.dot_dimension_numbers<[1], [0], [0], [1], [0, 0, 1, 1], [], []>} : vector<16x128xbf16>, vector<128x128xbf16>, vector<16x128xf32> -> vector<16x128xf32>
    %31 = arith.addf %30, %1 : vector<16x128xf32>
    %c0_11 = arith.constant 0 : index
    %c0_12 = arith.constant 0 : index
    %32 = vector.load %arg7[%c0_11, %c0_12] : memref<1x128xf32, #tpu.memory_space<vmem>>, vector<1x128xf32>
    %c0_13 = arith.constant 0 : index
    %c0_14 = arith.constant 0 : index
    %33 = vector.load %arg8[%c0_13, %c0_14] : memref<1x128xf32, #tpu.memory_space<vmem>>, vector<1x128xf32>
    %cst_15 = arith.constant dense<0.000000e+00> : vector<16xf32>
    %34 = vector.multi_reduction <add>, %31, %cst_15 [1] : vector<16x128xf32> to vector<16xf32>
    %35 = vector.shape_cast %34 : vector<16xf32> to vector<16x1xf32>
    %cst_16 = arith.constant 1.280000e+02 : f32
    %36 = vector.broadcast %cst_16 : f32 to vector<16x1xf32>
    %37 = arith.divf %35, %36 : vector<16x1xf32>
    %38 = vector.broadcast %37 : vector<16x1xf32> to vector<16x128xf32>
    %39 = arith.subf %31, %38 : vector<16x128xf32>
    %40 = arith.mulf %39, %39 : vector<16x128xf32>
    %cst_17 = arith.constant dense<0.000000e+00> : vector<16xf32>
    %41 = vector.multi_reduction <add>, %40, %cst_17 [1] : vector<16x128xf32> to vector<16xf32>
    %42 = vector.shape_cast %41 : vector<16xf32> to vector<16x1xf32>
    %cst_18 = arith.constant 1.280000e+02 : f32
    %43 = vector.broadcast %cst_18 : f32 to vector<16x1xf32>
    %44 = arith.divf %42, %43 : vector<16x1xf32>
    %45 = vector.broadcast %37 : vector<16x1xf32> to vector<16x128xf32>
    %46 = arith.subf %31, %45 : vector<16x128xf32>
    %cst_19 = arith.constant 9.99999997E-7 : f32
    %47 = vector.broadcast %cst_19 : f32 to vector<16x1xf32>
    %48 = arith.addf %44, %47 : vector<16x1xf32>
    %49 = math.rsqrt %48 : vector<16x1xf32>
    %50 = vector.broadcast %49 : vector<16x1xf32> to vector<16x128xf32>
    %51 = arith.mulf %46, %50 : vector<16x128xf32>
    %52 = vector.broadcast %32 : vector<1x128xf32> to vector<16x128xf32>
    %53 = arith.mulf %51, %52 : vector<16x128xf32>
    %54 = vector.broadcast %33 : vector<1x128xf32> to vector<16x128xf32>
    %55 = arith.addf %53, %54 : vector<16x128xf32>
    %56 = arith.truncf %55 : vector<16x128xf32> to vector<16x128xbf16>
    %c0_20 = arith.constant 0 : index
    %c0_21 = arith.constant 0 : index
    %57 = vector.load %arg4[%c0_20, %c0_21] : memref<128x128xbf16, #tpu.memory_space<vmem>>, vector<128x128xbf16>
    %cst_22 = arith.constant dense<0.000000e+00> : vector<16x128xf32>
    %58 = tpu.matmul %56, %57, %cst_22 {dimension_numbers = #tpu.dot_dimension_numbers<[1], [0], [0], [1], [0, 0, 1, 1], [], []>} : vector<16x128xbf16>, vector<128x128xbf16>, vector<16x128xf32> -> vector<16x128xf32>
    %c0_23 = arith.constant 0 : index
    %c0_24 = arith.constant 0 : index
    %59 = vector.load %arg5[%c0_23, %c0_24] : memref<1x128xf32, #tpu.memory_space<vmem>>, vector<1x128xf32>
    %60 = vector.broadcast %59 : vector<1x128xf32> to vector<16x128xf32>
    %61 = arith.addf %58, %60 : vector<16x128xf32>
    %cst_25 = arith.constant 0.000000e+00 : f32
    %62 = vector.broadcast %cst_25 : f32 to vector<16x128xf32>
    %63 = arith.maximumf %61, %62 : vector<16x128xf32>
    %cst_26 = arith.constant dense<0.000000e+00> : vector<16xf32>
    %64 = vector.multi_reduction <add>, %63, %cst_26 [1] : vector<16x128xf32> to vector<16xf32>
    %65 = vector.shape_cast %64 : vector<16xf32> to vector<16x1xf32>
    %cst_27 = arith.constant 1.280000e+02 : f32
    %66 = vector.broadcast %cst_27 : f32 to vector<16x1xf32>
    %67 = arith.divf %65, %66 : vector<16x1xf32>
    %68 = vector.broadcast %67 : vector<16x1xf32> to vector<16x128xf32>
    %69 = arith.subf %63, %68 : vector<16x128xf32>
    %70 = arith.mulf %69, %69 : vector<16x128xf32>
    %cst_28 = arith.constant dense<0.000000e+00> : vector<16xf32>
    %71 = vector.multi_reduction <add>, %70, %cst_28 [1] : vector<16x128xf32> to vector<16xf32>
    %72 = vector.shape_cast %71 : vector<16xf32> to vector<16x1xf32>
    %cst_29 = arith.constant 1.280000e+02 : f32
    %73 = vector.broadcast %cst_29 : f32 to vector<16x1xf32>
    %74 = arith.divf %72, %73 : vector<16x1xf32>
    %75 = vector.broadcast %67 : vector<16x1xf32> to vector<16x128xf32>
    %76 = arith.subf %63, %75 : vector<16x128xf32>
    %cst_30 = arith.constant 9.99999997E-7 : f32
    %77 = vector.broadcast %cst_30 : f32 to vector<16x1xf32>
    %78 = arith.addf %74, %77 : vector<16x1xf32>
    %79 = math.rsqrt %78 : vector<16x1xf32>
    %80 = vector.broadcast %79 : vector<16x1xf32> to vector<16x128xf32>
    %81 = arith.mulf %76, %80 : vector<16x128xf32>
    %82 = vector.broadcast %32 : vector<1x128xf32> to vector<16x128xf32>
    %83 = arith.mulf %81, %82 : vector<16x128xf32>
    %84 = vector.broadcast %33 : vector<1x128xf32> to vector<16x128xf32>
    %85 = arith.addf %83, %84 : vector<16x128xf32>
    %c0_31 = arith.constant 0 : index
    %c0_32 = arith.constant 0 : index
    %86 = vector.load %arg6[%c0_31, %c0_32] : memref<1x128xf32, #tpu.memory_space<vmem>>, vector<1x128xf32>
    %87 = vector.broadcast %86 : vector<1x128xf32> to vector<16x128xf32>
    %88 = arith.mulf %85, %87 : vector<16x128xf32>
    %cst_33 = arith.constant dense<0.000000e+00> : vector<16xf32>
    %89 = vector.multi_reduction <add>, %88, %cst_33 [1] : vector<16x128xf32> to vector<16xf32>
    %c0_34 = arith.constant 0 : index
    %90 = memref.load %arg9[%c0_34] : memref<1xf32, #tpu.memory_space<smem>>
    %91 = vector.broadcast %90 : f32 to vector<16xf32>
    %92 = arith.addf %89, %91 : vector<16xf32>
    %93 = arith.negf %92 : vector<16xf32>
    %94 = math.exp %93 : vector<16xf32>
    %cst_35 = arith.constant 1.000000e+00 : f32
    %95 = vector.broadcast %cst_35 : f32 to vector<16xf32>
    %96 = arith.addf %95, %94 : vector<16xf32>
    %97 = arith.divf %95, %96 : vector<16xf32>
    %98 = vector.shape_cast %97 : vector<16xf32> to vector<1x16xf32>
    %c0_36 = arith.constant 0 : index
    %c0_37 = arith.constant 0 : index
    %99 = vector.load %arg10[%c0_36, %c0_37] : memref<1x16xf32, #tpu.memory_space<vmem>>, vector<1x16xf32>
    tpu.vector_store %arg10[%c0_36, %c0_37], %98 {strides = array<i32>} : memref<1x16xf32, #tpu.memory_space<vmem>>, vector<1x16xf32>,
    return
  }
  func.func @transform_0(%arg0: i32) -> (i32, i32, i32) {
    %c0_i32 = arith.constant 0 : i32
    %c0_i32_0 = arith.constant 0 : i32
    %c0_i32_1 = arith.constant 0 : i32
    return %arg0, %c0_i32, %c0_i32_0 : i32, i32, i32
  }
  func.func @transform_1(%arg0: i32) -> (i32, i32) {
    %c0_i32 = arith.constant 0 : i32
    %c0_i32_0 = arith.constant 0 : i32
    %c0_i32_1 = arith.constant 0 : i32
    return %c0_i32, %c0_i32_0 : i32, i32
  }
  func.func @transform_2(%arg0: i32) -> (i32, i32) {
    %c0_i32 = arith.constant 0 : i32
    %c0_i32_0 = arith.constant 0 : i32
    %c0_i32_1 = arith.constant 0 : i32
    return %c0_i32, %c0_i32_0 : i32, i32
  }
  func.func @transform_3(%arg0: i32) -> (i32, i32) {
    %c0_i32 = arith.constant 0 : i32
    %c0_i32_0 = arith.constant 0 : i32
    %c0_i32_1 = arith.constant 0 : i32
    return %c0_i32, %c0_i32_0 : i32, i32
  }
  func.func @transform_4(%arg0: i32) -> (i32, i32) {
    %c0_i32 = arith.constant 0 : i32
    %c0_i32_0 = arith.constant 0 : i32
    %c0_i32_1 = arith.constant 0 : i32
    return %c0_i32, %c0_i32_0 : i32, i32
  }
  func.func @transform_5(%arg0: i32) -> (i32, i32) {
    %c0_i32 = arith.constant 0 : i32
    %c0_i32_0 = arith.constant 0 : i32
    %c0_i32_1 = arith.constant 0 : i32
    return %c0_i32, %c0_i32_0 : i32, i32
  }
  func.func @transform_6(%arg0: i32) -> (i32, i32) {
    %c0_i32 = arith.constant 0 : i32
    %c0_i32_0 = arith.constant 0 : i32
    %c0_i32_1 = arith.constant 0 : i32
    return %c0_i32, %c0_i32_0 : i32, i32
  }
  func.func @transform_7(%arg0: i32) -> (i32, i32) {
    %c0_i32 = arith.constant 0 : i32
    %c0_i32_0 = arith.constant 0 : i32
    %c0_i32_1 = arith.constant 0 : i32
    return %c0_i32, %c0_i32_0 : i32, i32
  }
  func.func @transform_8(%arg0: i32) -> i32 {
    %c0_i32 = arith.constant 0 : i32
    %c0_i32_0 = arith.constant 0 : i32
    return %c0_i32 : i32
  }
  func.func @transform_9(%arg0: i32) -> (i32, i32) {
    %c0_i32 = arith.constant 0 : i32
    %c0_i32_0 = arith.constant 0 : i32
    return %arg0, %c0_i32 : i32, i32
  }
}

module attributes {stable_mosaic.version = 11 : i64} {
  func.func @_vasnet_kernel(%arg0: i32, %arg1: memref<2x8x128xf32, #tpu.memory_space<vmem>>, %arg2: memref<128x384xbf16, #tpu.memory_space<vmem>>, %arg3: memref<128x128xbf16, #tpu.memory_space<vmem>>, %arg4: memref<128x128xbf16, #tpu.memory_space<vmem>>, %arg5: memref<1x128xf32, #tpu.memory_space<vmem>>, %arg6: memref<1x128xf32, #tpu.memory_space<vmem>>, %arg7: memref<1x128xf32, #tpu.memory_space<vmem>>, %arg8: memref<1x128xf32, #tpu.memory_space<vmem>>, %arg9: memref<1xf32, #tpu.memory_space<smem>>, %arg10: memref<1x16xf32, #tpu.memory_space<vmem>>) attributes {dimension_semantics = [#tpu.dimension_semantics<parallel>], iteration_bounds = array<i64: 1>, scalar_prefetch = 0 : i64, scratch_operands = 0 : i64, tpu.core_type = #tpu.core_type<tc>, window_params = [{transform_indices = @transform_0, window_bounds = array<i64: 2, 8, 128>}, {pipeline_mode = #tpu.pipeline_mode<synchronous>, transform_indices = @transform_1, window_bounds = array<i64: 128, 384>}, {pipeline_mode = #tpu.pipeline_mode<synchronous>, transform_indices = @transform_2, window_bounds = array<i64: 128, 128>}, {pipeline_mode = #tpu.pipeline_mode<synchronous>, transform_indices = @transform_3, window_bounds = array<i64: 128, 128>}, {pipeline_mode = #tpu.pipeline_mode<synchronous>, transform_indices = @transform_4, window_bounds = array<i64: 1, 128>}, {pipeline_mode = #tpu.pipeline_mode<synchronous>, transform_indices = @transform_5, window_bounds = array<i64: 1, 128>}, {pipeline_mode = #tpu.pipeline_mode<synchronous>, transform_indices = @transform_6, window_bounds = array<i64: 1, 128>}, {pipeline_mode = #tpu.pipeline_mode<synchronous>, transform_indices = @transform_7, window_bounds = array<i64: 1, 128>}, {transform_indices = @transform_8, window_bounds = array<i64: 1>}, {transform_indices = @transform_9, window_bounds = array<i64: 1, 16>}]} {
    %c0 = arith.constant 0 : index
    %c0_0 = arith.constant 0 : index
    %c0_1 = arith.constant 0 : index
    %0 = vector.load %arg1[%c0, %c0_0, %c0_1] : memref<2x8x128xf32, #tpu.memory_space<vmem>>, vector<2x8x128xf32>
    %1 = vector.shape_cast %0 : vector<2x8x128xf32> to vector<16x128xf32>
    %2 = arith.truncf %1 : vector<16x128xf32> to vector<16x128xbf16>
    %c0_2 = arith.constant 0 : index
    %c0_3 = arith.constant 0 : index
    %3 = vector.load %arg2[%c0_2, %c0_3] : memref<128x384xbf16, #tpu.memory_space<vmem>>, vector<128x384xbf16>
    %cst = arith.constant dense<0.000000e+00> : vector<16x384xf32>
    %4 = tpu.matmul %2, %3, %cst {dimension_numbers = #tpu.dot_dimension_numbers<[1], [0], [0], [1], [0, 0, 1, 1], [], []>} : vector<16x128xbf16>, vector<128x384xbf16>, vector<16x384xf32> -> vector<16x384xf32>
    %5 = vector.extract_strided_slice %4 {offsets = [0, 0], sizes = [16, 128], strides = [1, 1]} : vector<16x384xf32> to vector<16x128xf32>
    %6 = vector.shape_cast %5 : vector<16x128xf32> to vector<2x8x128xf32>
    %7 = arith.truncf %6 : vector<2x8x128xf32> to vector<2x8x128xbf16>
    %8 = vector.extract_strided_slice %4 {offsets = [0, 128], sizes = [16, 128], strides = [1, 1]} : vector<16x384xf32> to vector<16x128xf32>
    %9 = vector.shape_cast %8 : vector<16x128xf32> to vector<2x8x128xf32>
    %10 = arith.truncf %9 : vector<2x8x128xf32> to vector<2x8x128xbf16>
    %11 = vector.extract_strided_slice %4 {offsets = [0, 256], sizes = [16, 128], strides = [1, 1]} : vector<16x384xf32> to vector<16x128xf32>
    %12 = vector.shape_cast %11 : vector<16x128xf32> to vector<2x8x128xf32>
    %13 = arith.truncf %12 : vector<2x8x128xf32> to vector<2x8x128xbf16>
    "tpu.trace_start"() <{level = 10 : i32, message = "bqd,bkd->bqk"}> : () -> ()
    %cst_4 = arith.constant dense<0.000000e+00> : vector<2x8x8xf32>
    %14 = tpu.matmul %10, %7, %cst_4 {dimension_numbers = #tpu.dot_dimension_numbers<[2], [2], [1], [1], [0, 0, 0, 1, 1, 1], [0], [0]>} : vector<2x8x128xbf16>, vector<2x8x128xbf16>, vector<2x8x8xf32> -> vector<2x8x8xf32>
    "tpu.trace_stop"() : () -> ()
    %cst_5 = arith.constant dense<0xFF800000> : vector<2x8xf32>
    %15 = vector.multi_reduction <maximumf>, %14, %cst_5 [2] : vector<2x8x8xf32> to vector<2x8xf32>
    %16 = vector.shape_cast %15 : vector<2x8xf32> to vector<2x8x1xf32>
    %17 = vector.broadcast %16 : vector<2x8x1xf32> to vector<2x8x8xf32>
    %18 = arith.subf %14, %17 : vector<2x8x8xf32>
    %19 = math.exp %18 : vector<2x8x8xf32>
    %cst_6 = arith.constant dense<0.000000e+00> : vector<2x8xf32>
    %20 = vector.multi_reduction <add>, %19, %cst_6 [2] : vector<2x8x8xf32> to vector<2x8xf32>
    %21 = vector.shape_cast %20 : vector<2x8xf32> to vector<2x8x1xf32>
    %22 = tpu.reciprocal %21 {approx = true} : vector<2x8x1xf32> -> vector<2x8x1xf32>
    %23 = vector.broadcast %22 : vector<2x8x1xf32> to vector<2x8x8xf32>
    %24 = arith.mulf %19, %23 : vector<2x8x8xf32>
    %25 = arith.truncf %24 : vector<2x8x8xf32> to vector<2x8x8xbf16>
    "tpu.trace_start"() <{level = 10 : i32, message = "bqk,bkd->bqd"}> : () -> ()
    %cst_7 = arith.constant dense<0.000000e+00> : vector<2x8x128xf32>
    %26 = tpu.matmul %25, %13, %cst_7 {dimension_numbers = #tpu.dot_dimension_numbers<[2], [1], [1], [2], [0, 0, 0, 1, 1, 2], [0], [0]>} : vector<2x8x8xbf16>, vector<2x8x128xbf16>, vector<2x8x128xf32> -> vector<2x8x128xf32>
    "tpu.trace_stop"() : () -> ()
    %27 = vector.shape_cast %26 : vector<2x8x128xf32> to vector<16x128xf32>
    %28 = arith.truncf %27 : vector<16x128xf32> to vector<16x128xbf16>
    %c0_8 = arith.constant 0 : index
    %c0_9 = arith.constant 0 : index
    %29 = vector.load %arg3[%c0_8, %c0_9] : memref<128x128xbf16, #tpu.memory_space<vmem>>, vector<128x128xbf16>
    %cst_10 = arith.constant dense<0.000000e+00> : vector<16x128xf32>
    %30 = tpu.matmul %28, %29, %cst_10 {dimension_numbers = #tpu.dot_dimension_numbers<[1], [0], [0], [1], [0, 0, 1, 1], [], []>} : vector<16x128xbf16>, vector<128x128xbf16>, vector<16x128xf32> -> vector<16x128xf32>
    %31 = arith.addf %30, %1 : vector<16x128xf32>
    %c0_11 = arith.constant 0 : index
    %c0_12 = arith.constant 0 : index
    %32 = vector.load %arg7[%c0_11, %c0_12] : memref<1x128xf32, #tpu.memory_space<vmem>>, vector<1x128xf32>
    %c0_13 = arith.constant 0 : index
    %c0_14 = arith.constant 0 : index
    %33 = vector.load %arg8[%c0_13, %c0_14] : memref<1x128xf32, #tpu.memory_space<vmem>>, vector<1x128xf32>
    %cst_15 = arith.constant dense<0.000000e+00> : vector<16xf32>
    %34 = vector.multi_reduction <add>, %31, %cst_15 [1] : vector<16x128xf32> to vector<16xf32>
    %35 = vector.shape_cast %34 : vector<16xf32> to vector<16x1xf32>
    %cst_16 = arith.constant 1.280000e+02 : f32
    %36 = vector.broadcast %cst_16 : f32 to vector<16x1xf32>
    %37 = arith.divf %35, %36 : vector<16x1xf32>
    %38 = vector.broadcast %37 : vector<16x1xf32> to vector<16x128xf32>
    %39 = arith.subf %31, %38 : vector<16x128xf32>
    %40 = arith.mulf %39, %39 : vector<16x128xf32>
    %cst_17 = arith.constant dense<0.000000e+00> : vector<16xf32>
    %41 = vector.multi_reduction <add>, %40, %cst_17 [1] : vector<16x128xf32> to vector<16xf32>
    %42 = vector.shape_cast %41 : vector<16xf32> to vector<16x1xf32>
    %cst_18 = arith.constant 1.280000e+02 : f32
    %43 = vector.broadcast %cst_18 : f32 to vector<16x1xf32>
    %44 = arith.divf %42, %43 : vector<16x1xf32>
    %45 = vector.broadcast %37 : vector<16x1xf32> to vector<16x128xf32>
    %46 = arith.subf %31, %45 : vector<16x128xf32>
    %cst_19 = arith.constant 9.99999997E-7 : f32
    %47 = vector.broadcast %cst_19 : f32 to vector<16x1xf32>
    %48 = arith.addf %44, %47 : vector<16x1xf32>
    %49 = math.rsqrt %48 : vector<16x1xf32>
    %50 = vector.broadcast %49 : vector<16x1xf32> to vector<16x128xf32>
    %51 = arith.mulf %46, %50 : vector<16x128xf32>
    %52 = vector.broadcast %32 : vector<1x128xf32> to vector<16x128xf32>
    %53 = arith.mulf %51, %52 : vector<16x128xf32>
    %54 = vector.broadcast %33 : vector<1x128xf32> to vector<16x128xf32>
    %55 = arith.addf %53, %54 : vector<16x128xf32>
    %56 = arith.truncf %55 : vector<16x128xf32> to vector<16x128xbf16>
    %c0_20 = arith.constant 0 : index
    %c0_21 = arith.constant 0 : index
    %57 = vector.load %arg4[%c0_20, %c0_21] : memref<128x128xbf16, #tpu.memory_space<vmem>>, vector<128x128xbf16>
    %cst_22 = arith.constant dense<0.000000e+00> : vector<16x128xf32>
    %58 = tpu.matmul %56, %57, %cst_22 {dimension_numbers = #tpu.dot_dimension_numbers<[1], [0], [0], [1], [0, 0, 1, 1], [], []>} : vector<16x128xbf16>, vector<128x128xbf16>, vector<16x128xf32> -> vector<16x128xf32>
    %c0_23 = arith.constant 0 : index
    %c0_24 = arith.constant 0 : index
    %59 = vector.load %arg5[%c0_23, %c0_24] : memref<1x128xf32, #tpu.memory_space<vmem>>, vector<1x128xf32>
    %60 = vector.broadcast %59 : vector<1x128xf32> to vector<16x128xf32>
    %61 = arith.addf %58, %60 : vector<16x128xf32>
    %cst_25 = arith.constant 0.000000e+00 : f32
    %62 = vector.broadcast %cst_25 : f32 to vector<16x128xf32>
    %63 = arith.maximumf %61, %62 : vector<16x128xf32>
    %cst_26 = arith.constant dense<0.000000e+00> : vector<16xf32>
    %64 = vector.multi_reduction <add>, %63, %cst_26 [1] : vector<16x128xf32> to vector<16xf32>
    %65 = vector.shape_cast %64 : vector<16xf32> to vector<16x1xf32>
    %cst_27 = arith.constant 1.280000e+02 : f32
    %66 = vector.broadcast %cst_27 : f32 to vector<16x1xf32>
    %67 = arith.divf %65, %66 : vector<16x1xf32>
    %68 = vector.broadcast %67 : vector<16x1xf32> to vector<16x128xf32>
    %69 = arith.subf %63, %68 : vector<16x128xf32>
    %70 = arith.mulf %69, %69 : vector<16x128xf32>
    %cst_28 = arith.constant dense<0.000000e+00> : vector<16xf32>
    %71 = vector.multi_reduction <add>, %70, %cst_28 [1] : vector<16x128xf32> to vector<16xf32>
    %72 = vector.shape_cast %71 : vector<16xf32> to vector<16x1xf32>
    %cst_29 = arith.constant 1.280000e+02 : f32
    %73 = vector.broadcast %cst_29 : f32 to vector<16x1xf32>
    %74 = arith.divf %72, %73 : vector<16x1xf32>
    %75 = vector.broadcast %67 : vector<16x1xf32> to vector<16x128xf32>
    %76 = arith.subf %63, %75 : vector<16x128xf32>
    %cst_30 = arith.constant 9.99999997E-7 : f32
    %77 = vector.broadcast %cst_30 : f32 to vector<16x1xf32>
    %78 = arith.addf %74, %77 : vector<16x1xf32>
    %79 = math.rsqrt %78 : vector<16x1xf32>
    %80 = vector.broadcast %79 : vector<16x1xf32> to vector<16x128xf32>
    %81 = arith.mulf %76, %80 : vector<16x128xf32>
    %82 = vector.broadcast %32 : vector<1x128xf32> to vector<16x128xf32>
    %83 = arith.mulf %81, %82 : vector<16x128xf32>
    %84 = vector.broadcast %33 : vector<1x128xf32> to vector<16x128xf32>
    %85 = arith.addf %83, %84 : vector<16x128xf32>
    %c0_31 = arith.constant 0 : index
    %c0_32 = arith.constant 0 : index
    %86 = vector.load %arg6[%c0_31, %c0_32] : memref<1x128xf32, #tpu.memory_space<vmem>>, vector<1x128xf32>
    %87 = vector.broadcast %86 : vector<1x128xf32> to vector<16x128xf32>
    %88 = arith.mulf %85, %87 : vector<16x128xf32>
    %cst_33 = arith.constant dense<0.000000e+00> : vector<16xf32>
    %89 = vector.multi_reduction <add>, %88, %cst_33 [1] : vector<16x128xf32> to vector<16xf32>
    %c0_34 = arith.constant 0 : index
    %90 = memref.load %arg9[%c0_34] : memref<1xf32, #tpu.memory_space<smem>>
    %91 = vector.broadcast %90 : f32 to vector<16xf32>
    %92 = arith.addf %89, %91 : vector<16xf32>
    %93 = arith.negf %92 : vector<16xf32>
    %94 = math.exp %93 : vector<16xf32>
    %cst_35 = arith.constant 1.000000e+00 : f32
    %95 = vector.broadcast %cst_35 : f32 to vector<16xf32>
    %96 = arith.addf %95, %94 : vector<16xf32>
    %97 = arith.divf %95, %96 : vector<16xf32>
    %98 = vector.shape_cast %97 : vector<16xf32> to vector<1x16xf32>
    %c0_36 = arith.constant 0 : index
    %c0_37 = arith.constant 0 : index
    %99 = vector.load %arg10[%c0_36, %c0_37] : memref<1x16xf32, #tpu.memory_space<vmem>>, vector<1x16xf32>
    tpu.vector_store %arg10[%c0_36, %c0_37], %98 {strides = array<i32>} : memref<1x16xf32, #tpu.memory_space<vmem>>, vector<1x16xf32>,
    return
  }
  func.func @transform_0(%arg0: i32) -> (i32, i32, i32) {
    %c0_i32 = arith.constant 0 : i32
    %c0_i32_0 = arith.constant 0 : i32
    %c0_i32_1 = arith.constant 0 : i32
    return %arg0, %c0_i32, %c0_i32_0 : i32, i32, i32
  }
  func.func @transform_1(%arg0: i32) -> (i32, i32) {
    %c0_i32 = arith.constant 0 : i32
    %c0_i32_0 = arith.constant 0 : i32
    %c0_i32_1 = arith.constant 0 : i32
    return %c0_i32, %c0_i32_0 : i32, i32
  }
  func.func @transform_2(%arg0: i32) -> (i32, i32) {
    %c0_i32 = arith.constant 0 : i32
    %c0_i32_0 = arith.constant 0 : i32
    %c0_i32_1 = arith.constant 0 : i32
    return %c0_i32, %c0_i32_0 : i32, i32
  }
  func.func @transform_3(%arg0: i32) -> (i32, i32) {
    %c0_i32 = arith.constant 0 : i32
    %c0_i32_0 = arith.constant 0 : i32
    %c0_i32_1 = arith.constant 0 : i32
    return %c0_i32, %c0_i32_0 : i32, i32
  }
  func.func @transform_4(%arg0: i32) -> (i32, i32) {
    %c0_i32 = arith.constant 0 : i32
    %c0_i32_0 = arith.constant 0 : i32
    %c0_i32_1 = arith.constant 0 : i32
    return %c0_i32, %c0_i32_0 : i32, i32
  }
  func.func @transform_5(%arg0: i32) -> (i32, i32) {
    %c0_i32 = arith.constant 0 : i32
    %c0_i32_0 = arith.constant 0 : i32
    %c0_i32_1 = arith.constant 0 : i32
    return %c0_i32, %c0_i32_0 : i32, i32
  }
  func.func @transform_6(%arg0: i32) -> (i32, i32) {
    %c0_i32 = arith.constant 0 : i32
    %c0_i32_0 = arith.constant 0 : i32
    %c0_i32_1 = arith.constant 0 : i32
    return %c0_i32, %c0_i32_0 : i32, i32
  }
  func.func @transform_7(%arg0: i32) -> (i32, i32) {
    %c0_i32 = arith.constant 0 : i32
    %c0_i32_0 = arith.constant 0 : i32
    %c0_i32_1 = arith.constant 0 : i32
    return %c0_i32, %c0_i32_0 : i32, i32
  }
  func.func @transform_8(%arg0: i32) -> i32 {
    %c0_i32 = arith.constant 0 : i32
    %c0_i32_0 = arith.constant 0 : i32
    return %c0_i32 : i32
  }
  func.func @transform_9(%arg0: i32) -> (i32, i32) {
    %c0_i32 = arith.constant 0 : i32
    %c0_i32_0 = arith.constant 0 : i32
    return %arg0, %c0_i32 : i32, i32
  }
}

</mosaic_0001>

<bundles_post_ra>
// kernel: tpu_custom_call.1
= control target key start
LH: loop header
LB: loop body
LE: loop exit
PB: predicated region body
PF: predicated region fallthrough
CT: control target
= control target key end

     0   :  { %15 = vsyncpa [#allocation4], 0  ;;  %s1404_s0 = inlined_call_operand.hbm [shape: f32[2,8,128], index: 0, kind: input, shape index: {}]   ;;  %s1405_s1 = inlined_call_operand.hbm [shape: bf16[128,384], index: 1, kind: input, shape index: {}]   ;;  %s1406_s2 = inlined_call_operand.hbm [shape: bf16[128,128], index: 2, kind: input, shape index: {}]   ;;  %s1407_s3 = inlined_call_operand.hbm [shape: bf16[128,128], index: 3, kind: input, shape index: {}]   ;;  %s1408_s4 = inlined_call_operand.vmem [shape: f32[1,128], index: 4, kind: input, shape index: {}]   ;;  %s1409_s5 = inlined_call_operand.vmem [shape: f32[1,128], index: 5, kind: input, shape index: {}]   ;;  %s1410_s6 = inlined_call_operand.vmem [shape: f32[1,128], index: 6, kind: input, shape index: {}]   ;;  %s1411_s7 = inlined_call_operand.vmem [shape: f32[1,128], index: 7, kind: input, shape index: {}]   ;;  %s1412_s8 = inlined_call_operand.<no memory space> [shape: f32[1], index: 8, kind: input, shape index: {}]   ;;  %s1413_s9 = inlined_call_operand.hbm [shape: f32[1,16], index: 9, kind: output, shape index: {}]  }
   0x1   :  { %16 = vsyncpa [#allocation7], 0 }
   0x2   :  { %17 = vsyncpa [#allocation10], 0 }
   0x3   :  { %18 = vsyncpa [#allocation5], 0  ;;  %s1254_s30 = smov [#allocation6]  }
   0x4   :  { %s36_s10 = sshll.u32 %s1254_s30, 4  ;;  %s37_s10 = int_to_ptr.vmem [resolvable:$true] %s36_s10 }
   0x5   :  { %s1154_s11 = scalar_lea.vmem %s37_s10, 3072  ;;  %p1159_p1 = scmp.lt.s32.totalorder %s37_s10, %s37_s10 }
   0x6   :  { %p1155_p0 = scmp.ne.s32.totalorder %s37_s10, %s1154_s11  ;;  %p1160_p2 = scmp.lt.s32.totalorder %s1154_s11, %s1154_s11 }
   0x8   :  { %p1161_p3 = por %p1160_p2, %p1159_p1 }
   0xa   :  { %p1162_p4 = pnand %p1161_p3, %p1155_p0 }
   0xc   :  { %1165 = shalt.err (!%p1162_p4)
}
   0xd   :  { %s1255_s12 = smov 192   ;;  %s1256_s13 = smov 12  }
   0xe   :  { %42 = dma.hbm_to_vmem [thread:$0]  %s1405_s1, 3072, %s37_s10, [#allocation7], %s1255_s12, %s1255_s12, %s1256_s13  }
   0xf   :  { %s1257_s16 = smov [#allocation3]  }
  0x10   :  { %s24_s17 = sshll.u32 %s1257_s16, 4  ;;  %s25_s17 = int_to_ptr.vmem [resolvable:$true] %s24_s17 }
  0x11   :  { %s1174_s18 = scalar_lea.vmem %s25_s17, 256  ;;  %p1179_p6 = scmp.lt.s32.totalorder %s25_s17, %s25_s17 }
  0x12   :  { %p1175_p5 = scmp.ne.s32.totalorder %s25_s17, %s1174_s18  ;;  %p1180_p7 = scmp.lt.s32.totalorder %s1174_s18, %s1174_s18 }
  0x14   :  { %p1181_p8 = por %p1180_p7, %p1179_p6 }
  0x16   :  { %p1182_p9 = pnand %p1181_p8, %p1175_p5 }
  0x18   :  { %1185 = shalt.err (!%p1182_p9)
}
  0x19   :  { %s1258_s19 = smov 128   ;;  %s1259_s20 = smov 8  }
  0x1a   :  { %30 = dma.hbm_to_vmem [thread:$0]  %s1404_s0, 256, %s25_s17, [#allocation4], %s1258_s19, %s1258_s19, %s1259_s20  }
  0x1b   :  { %s1260_s23 = smov [#allocation8]  }
  0x1c   :  { %s48_s24 = sshll.u32 %s1260_s23, 4  ;;  %s49_s24 = int_to_ptr.vmem [resolvable:$true] %s48_s24 }
  0x1d   :  { %s1194_s1 = scalar_lea.vmem %s49_s24, 1024  ;;  %p1199_p11 = scmp.lt.s32.totalorder %s49_s24, %s49_s24 }
  0x1e   :  { %p1195_p10 = scmp.ne.s32.totalorder %s49_s24, %s1194_s1  ;;  %p1200_p12 = scmp.lt.s32.totalorder %s1194_s1, %s1194_s1 }
  0x20   :  { %p1201_p13 = por %p1200_p12, %p1199_p11 }
  0x22   :  { %p1202_p0 = pnand %p1201_p13, %p1195_p10 }
  0x24   :  { %1205 = shalt.err (!%p1202_p0)
}
  0x25   :  { %s1261_s25 = smov 64   ;;  %s1262_s26 = smov 4  }
  0x26   :  { %54 = dma.hbm_to_vmem [thread:$0]  %s1406_s2, 1024, %s49_s24, [#allocation7], %s1261_s25, %s1261_s25, %s1262_s26  }
  0x27   :  { %s1263_s29 = smov [#allocation9]  }
  0x28   :  { %s60_s30 = sshll.u32 %s1263_s29, 4  ;;  %s61_s30 = int_to_ptr.vmem [resolvable:$true] %s60_s30 }
  0x29   :  { %s1214_s0 = scalar_lea.vmem %s61_s30, 1024  ;;  %p1219_p2 = scmp.lt.s32.totalorder %s61_s30, %s61_s30 }
  0x2a   :  { %p1215_p1 = scmp.ne.s32.totalorder %s61_s30, %s1214_s0  ;;  %p1220_p3 = scmp.lt.s32.totalorder %s1214_s0, %s1214_s0 }
  0x2c   :  { %p1221_p4 = por %p1220_p3, %p1219_p2 }
  0x2e   :  { %p1222_p5 = pnand %p1221_p4, %p1215_p1 }
  0x30   :  { %1225 = shalt.err (!%p1222_p5)
}
  0x31   :  { %66 = dma.hbm_to_vmem [thread:$0]  %s1407_s3, 1024, %s61_s30, [#allocation10], %s1261_s25, %s1261_s25, %s1262_s26  }
  0x32   :  { %1246 = dma.done.wait [#allocation4], 256  }
  0x33   :  { %1247 = vsyncadd [#allocation4], 4294967040 }
  0x34   :  { %1248 = dma.done.wait [#allocation7], 4096  }
  0x35   :  { %1249 = vsyncadd [#allocation7], 4294963200 }
  0x36   :  { %1250 = dma.done.wait [#allocation10], 1024  }
  0x37   :  { %1251 = vsyncadd [#allocation10], 4294966272  ;;  %v1264_v0 = vmov 0   ;;  %v1265_v1 = vmov 0.0   ;;  %v1074_v2 = vld [vmem:[#allocation6 + $0xac] ss:$12 sps:$4 sm:$0xff]  }
  0x38   :  { %285 = vmatprep.mubr.bf16.mxu0 %v1264_v0  ;;  %976 = vmatprep.subr.bf16.mxu1 %v1265_v1  ;;  %v1076_v3 = vld [vmem:[#allocation6 + $0xa8] ss:$12 sps:$4 sm:$0xff]   ;;  %v1079_v5 = vld [vmem:[#allocation6 + $0x90] ss:$12 sps:$4 sm:$0xff]   ;;  %v1082_v7 = vld [vmem:[#allocation6 + $0x78] ss:$12 sps:$4 sm:$0xff]  }
  0x39   :  { %253 = vmatprep.subr.bf16.mxu0 %v1074_v2  ;;  %v1077_v4 = vld [vmem:[#allocation6 + $0x94] ss:$12 sps:$4 sm:$0xff]   ;;  %v1080_v6 = vld [vmem:[#allocation6 + $0x7c] ss:$12 sps:$4 sm:$0xff]   ;;  %v1083_v8 = vld [vmem:[#allocation6 + $0x64] ss:$12 sps:$4 sm:$0xff]  }
  0x3a   :  { %254 = vmatpush1.bf16.msra.mxu0 %v1076_v3  ;;  %v1085_v9 = vld [vmem:[#allocation6 + $0x60] ss:$12 sps:$4 sm:$0xff]   ;;  %v1098_v11 = vld [vmem:[#allocation6 + $0xb0] ss:$12 sps:$4 sm:$0xff]   ;;  %v1099_v12 = vld [vmem:[#allocation6 + $0x98] ss:$12 sps:$4 sm:$0xff]  }
  0x3b   :  { %255 = vmatprep.subr.bf16.mxu0 %v1077_v4  ;;  %v1086_v10 = vld [vmem:[#allocation6 + $0x4c] ss:$12 sps:$4 sm:$0xff]   ;;  %977 = vmatpush3.bf16.msra.mxu1 %v1098_v11  ;;  %v1088_v13 = vld [vmem:[#allocation6 + $0x48] ss:$12 sps:$4 sm:$0xff]   ;;  %v1091_v15 = vld [vmem:[#allocation6 + $0x30] ss:$12 sps:$4 sm:$0xff]  }
  0x3c   :  { %978 = vmatprep.subr.bf16.mxu1 %v1265_v1  ;;  %v1089_v14 = vld [vmem:[#allocation6 + $0x34] ss:$12 sps:$4 sm:$0xff]   ;;  %v1092_v17 = vld [vmem:[#allocation6 + $0x1c] ss:$12 sps:$4 sm:$0xff]   ;;  %v1094_v19 = vld [vmem:[#allocation6 + $0x18] ss:$12 sps:$4 sm:$0xff]  }
  0x3d   :  { %v1100_v16 = vld [vmem:[#allocation6 + $0x80] ss:$12 sps:$4 sm:$0xff]   ;;  %v1101_v18 = vld [vmem:[#allocation6 + $0x68] ss:$12 sps:$4 sm:$0xff]   ;;  %v1095_v20 = vld [vmem:[#allocation6 + $0x4] ss:$12 sps:$4 sm:$0xff]  }
  0x3e   :  { %256 = vmatpush1.bf16.msra.mxu0 %v1079_v5  ;;  %v1102_v21 = vld [vmem:[#allocation6 + $0x50] ss:$12 sps:$4 sm:$0xff]   ;;  %v1097_v22 = vld [vmem:[#allocation6] ss:$12 sps:$4 sm:$0xff]   ;;  %v1103_v26 = vld [vmem:[#allocation6 + $0x38] ss:$12 sps:$4 sm:$0xff]  }
  0x3f   :  { %257 = vmatprep.subr.bf16.mxu0 %v1080_v6  ;;  %979 = vmatpush3.bf16.msra.mxu1 %v1099_v12  ;;  %v1334_v23 = vld [vmem:[#allocation3] sm:$0xff]  ;;  %v1336_v24 = vld [vmem:[#allocation3 + $0x8] sm:$0xff]  ;;  %v1104_v27 = vld [vmem:[#allocation6 + $0x20] ss:$12 sps:$4 sm:$0xff]   ;;  %vm1266_vm0 = vmmov 0   ;;  %vm451_vm1 = vcmask 1043456  }
  0x40   :  { %980 = vmatprep.subr.bf16.mxu1 %v1265_v1  ;;  %v92_v25 = vpack.c.bf16 %v1336_v24, %v1334_v23  ;;  %v1105_v28 = vld [vmem:[#allocation6 + $0x8] ss:$12 sps:$4 sm:$0xff]   ;;  %992 = vmatprep.mubr.msk.bf16.mxu1 %vm1266_vm0, %v1265_v1  ;;  %vm423_vm2 = vcmask 64512   ;;  %v1106_v6 = vld [vmem:[#allocation8 + $0x38] sm:$0xff]   ;;  %vm871_vm3 = vcmask 130112   ;;  %vm874_vm4 = vcmask 122880  }
  0x41   :  { %v1108_v12 = vld [vmem:[#allocation8 + $0x28] sm:$0xff]  }
  0x42   :  { %258 = vmatpush1.bf16.msra.mxu0 %v1082_v7 }
  0x43   :  { %259 = vmatprep.subr.bf16.mxu0 %v1083_v8  ;;  %981 = vmatpush3.bf16.msra.mxu1 %v1100_v16  ;;  %v1112_v16 = vld [vmem:[#allocation8 + $0x8] sm:$0xff]  }
  0x44   :  { %982 = vmatprep.subr.bf16.mxu1 %v1265_v1 }
  0x46   :  { %260 = vmatpush1.bf16.msra.mxu0 %v1085_v9 }
  0x47   :  { %261 = vmatprep.subr.bf16.mxu0 %v1086_v10  ;;  %983 = vmatpush3.bf16.msra.mxu1 %v1101_v18  ;;  %v1107_v10 = vld [vmem:[#allocation8 + $0x30] sm:$0xff]  }
  0x48   :  { %984 = vmatprep.subr.bf16.mxu1 %v1265_v1 }
  0x4a   :  { %262 = vmatpush1.bf16.msra.mxu0 %v1088_v13  ;;  %v1109_v13 = vld [vmem:[#allocation8 + $0x20] sm:$0xff]  }
  0x4b   :  { %263 = vmatprep.subr.bf16.mxu0 %v1089_v14  ;;  %985 = vmatpush3.bf16.msra.mxu1 %v1102_v21  ;;  %v1110_v14 = vld [vmem:[#allocation8 + $0x18] sm:$0xff]  }
  0x4c   :  { %986 = vmatprep.subr.bf16.mxu1 %v1265_v1 }
  0x4e   :  { %264 = vmatpush1.bf16.msra.mxu0 %v1091_v15  ;;  %v1111_v15 = vld [vmem:[#allocation8 + $0x10] sm:$0xff]  }
  0x4f   :  { %265 = vmatprep.subr.bf16.mxu0 %v1092_v17  ;;  %987 = vmatpush3.bf16.msra.mxu1 %v1103_v26  ;;  %v1113_v17 = vld [vmem:[#allocation8] sm:$0xff]  }
  0x50   :  { %988 = vmatprep.subr.bf16.mxu1 %v1265_v1 }
  0x52   :  { %266 = vmatpush1.bf16.msra.mxu0 %v1094_v19 }
  0x53   :  { %267 = vmatprep.subr.bf16.mxu0 %v1095_v20  ;;  %989 = vmatpush3.bf16.msra.mxu1 %v1104_v27 }
  0x54   :  { %990 = vmatprep.subr.bf16.mxu1 %v1265_v1 }
  0x56   :  { %268 = vmatpush1.bf16.msra.mxu0 %v1097_v22 }
  0x57   :  { %996 = vmatprep.subr.bf16.mxu0 %v1265_v1  ;;  %991 = vmatpush3.bf16.msra.mxu1 %v1105_v28 }
  0x58   :  { %1002 = vmatprep.subr.bf16.mxu1 %v1265_v1 }
  0x59   :  { %286 = vmatmul.mubr.bf16.vlgmr.msra.gmra.mxu0 %v92_v25 }
  0x5a   :  { %998 = vmatprep.mubr.msk.bf16.mxu0 %vm1266_vm0, %v1265_v1  ;;  %993 = vmatmul.mubr.bf16.vlgmr.msra.gmra.mxu1 %v92_v25 }
  0x5b   :  { %1004 = vmatprep.mubr.msk.bf16.mxu1 %vm1266_vm0, %v1265_v1 }
 0x119   :  { %v287_v29 = vpop.f32.mrf.mxu0 }
 0x11a   :  { %v337_v30 = vpack.c.bf16 %v287_v29, %v287_v29  ;;  %v330_v37 = vpop.f32.mrf.mxu1 }
 0x11b   :  { %v289_v31 = vpop.f32.mrf.mxu0  ;;  %v341_v38 = vpack.c.bf16 %v330_v37, %v330_v37 }
 0x11c   :  { %997 = vmatpush3.bf16.xpose.msra.mxu0 %v337_v30  ;;  %v339_v34 = vpack.c.bf16 %v289_v31, %v289_v31  ;;  %v994_v39 = vpop.f32.mrf.mxu1 }
 0x11d   :  { %v291_v32 = vpop.f32.mrf.mxu0  ;;  %1008 = vmatprep.subr.bf16.mxu0 %v1265_v1  ;;  %v453_v40 = vsel %vm451_vm1, %v341_v38, 0 }
 0x11e   :  { %v338_v33 = vpack.c.bf16 %v291_v32, %v291_v32  ;;  %v333_v41 = vpop.f32.mrf.mxu1 }
 0x11f   :  { %v293_v35 = vpop.f32.mrf.mxu0  ;;  %v342_v42 = vpack.c.bf16 %v333_v41, %v333_v41 }
 0x120   :  { %1003 = vmatpush3.bf16.xpose.msra.mxu1 %v338_v33  ;;  %v340_v36 = vpack.c.bf16 %v293_v35, %v293_v35  ;;  %v995_v43 = vpop.f32.mrf.mxu1  ;;  %v1114_v35 = vld [vmem:[#allocation9 + $0x38] sm:$0xff]  }
 0x121   :  { %1014 = vmatprep.subr.bf16.mxu1 %v1265_v1  ;;  %v499_v44 = vsel %vm451_vm1, %v342_v42, 0  ;;  %v1115_v43 = vld [vmem:[#allocation9 + $0x30] sm:$0xff]  }
 0x123   :  { %999 = vmatmul.mubr.bf16.vlgmr.msra.gmra.mxu0 %v339_v34 }
 0x124   :  { %1010 = vmatprep.mubr.msk.bf16.mxu0 %vm1266_vm0, %v1265_v1  ;;  %1009 = vmatpush3.bf16.msra.mxu0 %v453_v40 }
 0x125   :  { %1020 = vmatprep.subr.bf16.mxu0 %v1265_v1 }
 0x127   :  { %1005 = vmatmul.mubr.bf16.vlgmr.msra.gmra.mxu1 %v340_v36 }
 0x128   :  { %1016 = vmatprep.mubr.msk.bf16.mxu1 %vm1266_vm0, %v1265_v1  ;;  %1015 = vmatpush3.bf16.msra.mxu1 %v499_v44  ;;  %v1117_v44 = vld [vmem:[#allocation9 + $0x20] sm:$0xff]  }
 0x129   :  { %1040 = vmatprep.subr.bf16.mxu1 %v1265_v1 }
 0x1e3   :  { %v377_v45 = vpop.f32.mrf.mxu0 }
 0x1e4   :  { %v424_v46 = vsel %vm423_vm2, %v377_v45, -inf }
 0x1e5   :  { %425 = vmax.xlane.f32.xlu0 %v424_v46  ;;  %v1000_v47 = vpop.f32.mrf.mxu0  ;;  %v1119_v46 = vld [vmem:[#allocation9 + $0x10] sm:$0xff]  }
 0x1e6   :  { %v1120_v47 = vld [vmem:[#allocation9 + $0x8] sm:$0xff]  }
 0x1e7   :  { %v380_v48 = vpop.f32.mrf.mxu0  ;;  %v417_v49 = vpop.f32.mrf.mxu1 }
 0x1e8   :  { %v427_v50 = vsel %vm423_vm2, %v417_v49, -inf  ;;  %v1121_v48 = vld [vmem:[#allocation9] sm:$0xff]  }
 0x1e9   :  { %v1001_v51 = vpop.f32.mrf.mxu0  ;;  %428 = vmax.xlane.f32.xlu0 %v427_v50  ;;  %v1006_v52 = vpop.f32.mrf.mxu1 }
 0x1eb   :  { %v420_v53 = vpop.f32.mrf.mxu1 }
 0x1ed   :  { %v1007_v54 = vpop.f32.mrf.mxu1 }
 0x26e   :  { %v426_v55 = vpop.xlane.xlu0 %425 }
 0x26f   :  { %v430_v56 = vsub.f32 %v377_v45, %v426_v55  ;;  %v1118_v45 = vld [vmem:[#allocation9 + $0x18] sm:$0xff]  }
 0x271   :  { %v432_v57 = vmul.f32 1.442695, %v430_v56 }
 0x272   :  { %v429_v58 = vpop.xlane.xlu0 %428 }
 0x273   :  { %1122 = vpow2.f32 %v432_v57  ;;  %v431_v59 = vsub.f32 %v417_v49, %v429_v58  ;;  %v927_v57 = vld [vmem:[%s1410_s6] ss:$0 sm:$0xff] }
 0x275   :  { %v434_v60 = vmul.f32 1.442695, %v431_v59 }
 0x277   :  { %1124 = vpow2.f32 %v434_v60 }
 0x280   :  { %v1123_v61 = vpop.eup %1122 }
 0x281   :  { %v436_v62 = vsel %vm423_vm2, %v1123_v61, 0.0 }
 0x282   :  { %437 = vadd.xlane.f32.xlu1 %v436_v62 }
 0x284   :  { %v1125_v63 = vpop.eup %1124 }
 0x285   :  { %v439_v0 = vsel %vm423_vm2, %v1125_v63, 0.0 }
 0x286   :  { %440 = vadd.xlane.f32.xlu1 %v439_v0 }
 0x30b   :  { %v438_v2 = vpop.xlane.xlu1 %437 }
 0x30c   :  { %1126 = vrcp.f32 %v438_v2  ;;  %v929_v2 = vld [vmem:[%s1408_s4] ss:$0 sm:$0xff] }
 0x30f   :  { %v441_v3 = vpop.xlane.xlu1 %440 }
 0x310   :  { %1128 = vrcp.f32 %v441_v3 }
 0x319   :  { %v1127_v4 = vpop.eup %1126 }
 0x31a   :  { %v444_v5 = vmul.f32 %v1127_v4, %v1123_v61 }
 0x31c   :  { %v446_v7 = vpack.c.bf16 %v444_v5, %v444_v5 }
 0x31d   :  { %v1129_v8 = vpop.eup %1128 }
 0x31e   :  { %1011 = vmatmul.mubr.msk.bf16.vlgmr.msra.gmra.mxu0 %vm423_vm2, %v446_v7  ;;  %v445_v9 = vmul.f32 %v1129_v8, %v1125_v63 }
 0x31f   :  { %1021 = vmatpush3.bf16.msra.mxu0 %v1106_v6  ;;  %1036 = vmatprep.mubr.msk.bf16.mxu0 %vm1266_vm0, %v1265_v1 }
 0x320   :  { %v447_v11 = vpack.c.bf16 %v445_v9, %v445_v9  ;;  %1022 = vmatprep.subr.bf16.mxu0 %v1265_v1 }
 0x322   :  { %1017 = vmatmul.mubr.msk.bf16.vlgmr.msra.gmra.mxu1 %vm423_vm2, %v447_v11 }
 0x323   :  { %1023 = vmatpush3.bf16.msra.mxu0 %v1107_v10  ;;  %1056 = vmatprep.mubr.msk.bf16.mxu1 %vm1266_vm0, %v1265_v1 }
 0x324   :  { %1024 = vmatprep.subr.bf16.mxu0 %v1265_v1  ;;  %1041 = vmatpush3.bf16.msra.mxu1 %v1114_v35 }
 0x325   :  { %1042 = vmatprep.subr.bf16.mxu1 %v1265_v1 }
 0x327   :  { %1025 = vmatpush3.bf16.msra.mxu0 %v1108_v12 }
 0x328   :  { %1026 = vmatprep.subr.bf16.mxu0 %v1265_v1  ;;  %1043 = vmatpush3.bf16.msra.mxu1 %v1115_v43 }
 0x329   :  { %1044 = vmatprep.subr.bf16.mxu1 %v1265_v1 }
 0x32b   :  { %1027 = vmatpush3.bf16.msra.mxu0 %v1109_v13 }
 0x32c   :  { %1028 = vmatprep.subr.bf16.mxu0 %v1265_v1 }
 0x32f   :  { %1029 = vmatpush3.bf16.msra.mxu0 %v1110_v14 }
 0x330   :  { %1030 = vmatprep.subr.bf16.mxu0 %v1265_v1 }
 0x333   :  { %1031 = vmatpush3.bf16.msra.mxu0 %v1111_v15 }
 0x334   :  { %1032 = vmatprep.subr.bf16.mxu0 %v1265_v1 }
 0x337   :  { %1033 = vmatpush3.bf16.msra.mxu0 %v1112_v16 }
 0x338   :  { %1034 = vmatprep.subr.bf16.mxu0 %v1265_v1 }
 0x33b   :  { %1035 = vmatpush3.bf16.msra.mxu0 %v1113_v17 }
 0x3de   :  { %v489_v18 = vpop.f32.mrf.mxu0 }
 0x3e0   :  { %v1012_v19 = vpop.f32.mrf.mxu0 }
 0x3e2   :  { %v492_v20 = vpop.f32.mrf.mxu0  ;;  %v535_v21 = vpop.f32.mrf.mxu1 }
 0x3e3   :  { %v541_v22 = vpack.c.bf16 %v535_v21, %v489_v18 }
 0x3e4   :  { %v1013_v25 = vpop.f32.mrf.mxu0  ;;  %v1018_v26 = vpop.f32.mrf.mxu1 }
 0x3e5   :  { %1037 = vmatmul.mubr.bf16.vlgmr.msra.gmra.mxu0 %v541_v22 }
 0x3e6   :  { %v538_v27 = vpop.f32.mrf.mxu1 }
 0x3e8   :  { %v1019_v28 = vpop.f32.mrf.mxu1 }
 0x4a5   :  { %v640_v29 = vpop.f32.mrf.mxu0 }
 0x4a6   :  { %v641_v30 = vadd.f32 %v640_v29, %v1334_v23 }
 0x4a7   :  { %v1038_v31 = vpop.f32.mrf.mxu0 }
 0x4a8   :  { %649 = vadd.xlane.f32.xlu0 %v641_v30  ;;  %v938_v31 = vld [vmem:[%s1409_s5] ss:$0 sm:$0xff]  ;;  %s1267_s5 = smov [#allocation11]  }
 0x4a9   :  { %v643_v32 = vpop.f32.mrf.mxu0 }
 0x4aa   :  { %v644_v33 = vadd.f32 %v643_v32, %v1336_v24  ;;  %v1116_v24 = vld [vmem:[#allocation9 + $0x28] sm:$0xff]  }
 0x4ab   :  { %v1039_v34 = vpop.f32.mrf.mxu0  ;;  %1045 = vmatpush3.bf16.msra.mxu1 %v1116_v24 }
 0x4ac   :  { %651 = vadd.xlane.f32.xlu1 %v644_v33  ;;  %1046 = vmatprep.subr.bf16.mxu1 %v1265_v1 }
 0x4af   :  { %1047 = vmatpush3.bf16.msra.mxu1 %v1117_v44 }
 0x4b0   :  { %1048 = vmatprep.subr.bf16.mxu1 %v1265_v1 }
 0x4b3   :  { %1049 = vmatpush3.bf16.msra.mxu1 %v1118_v45 }
 0x4b4   :  { %1050 = vmatprep.subr.bf16.mxu1 %v1265_v1 }
 0x4b7   :  { %1051 = vmatpush3.bf16.msra.mxu1 %v1119_v46 }
 0x4b8   :  { %1052 = vmatprep.subr.bf16.mxu1 %v1265_v1 }
 0x4bb   :  { %1053 = vmatpush3.bf16.msra.mxu1 %v1120_v47  ;;  %v860_v47 = vlaneseq }
 0x4bc   :  { %1054 = vmatprep.subr.bf16.mxu1 %v1265_v1  ;;  %v928_v1 = vld [vmem:[%s1411_s7] ss:$0 sm:$0xff] }
 0x4bf   :  { %1055 = vmatpush3.bf16.msra.mxu1 %v1121_v48  ;;  %v861_v48 = vand.u32 127, %v860_v47 }
 0x531   :  { %v650_v36 = vpop.xlane.xlu0 %649 }
 0x532   :  { %v654_v37 = vmul.f32 0.0078125, %v650_v36 }
 0x534   :  { %v656_v38 = vsub.f32 %v641_v30, %v654_v37 }
 0x535   :  { %v652_v39 = vpop.xlane.xlu1 %651 }
 0x536   :  { %v655_v40 = vmul.f32 0.0078125, %v652_v39  ;;  %v658_v41 = vmul.f32 %v656_v38, %v656_v38 }
 0x538   :  { %v657_v42 = vsub.f32 %v644_v33, %v655_v40  ;;  %660 = vadd.xlane.f32.xlu0 %v658_v41 }
 0x53a   :  { %v659_v23 = vmul.f32 %v657_v42, %v657_v42 }
 0x53c   :  { %662 = vadd.xlane.f32.xlu1 %v659_v23 }
 0x5c1   :  { %v661_v49 = vpop.xlane.xlu0 %660 }
 0x5c2   :  { %v664_v50 = vmul.f32 0.0078125, %v661_v49  ;;  %v863_v49 = vshrl.u32 %v860_v47, 7 }
 0x5c4   :  { %v666_v51 = vadd.f32 1e-06, %v664_v50  ;;  %v866_v50 = vadd.s32 4294967288, %v861_v48 }
 0x5c5   :  { %v663_v52 = vpop.xlane.xlu1 %662 }
 0x5c6   :  { %1130 = vrsqrt.f32 %v666_v51  ;;  %v665_v53 = vmul.f32 0.0078125, %v663_v52  ;;  %v864_v51 = vsub.s32 %v861_v48, %v863_v49  ;;  %v869_v52 = vsub.s32 %v866_v50, %v863_v49 }
 0x5c8   :  { %v667_v54 = vadd.f32 1e-06, %v665_v53 }
 0x5ca   :  { %1132 = vrsqrt.f32 %v667_v54 }
 0x5d3   :  { %v1131_v55 = vpop.eup %1130 }
 0x5d4   :  { %v670_v56 = vmul.f32 %v1131_v55, %v656_v38  ;;  %v843_v38 = vstv %s1412_s8  ;;  %s882_s8 = sshll.u32 %s1267_s5, 4  ;;  %s883_s8 = int_to_ptr.vmem [resolvable:$true] %s882_s8 }
 0x5d5   :  { %s1226_s17 = scalar_lea.vmem %s883_s8, 16  ;;  %s1230_s18 = scalar_lea.vmem %s883_s8, 32 }
 0x5d6   :  { %v678_v60 = vmul.f32 %v927_v57, %v670_v56  ;;  %p1227_p6 = scmp.ne.s32.totalorder %s883_s8, %s1226_s17  ;;  %p1231_p7 = scmp.lt.s32.totalorder %s883_s8, %s883_s8 }
 0x5d7   :  { %v1133_v58 = vpop.eup %1132  ;;  %p1232_p8 = scmp.lt.s32.totalorder %s1230_s18, %s1226_s17 }
 0x5d8   :  { %v671_v59 = vmul.f32 %v1133_v58, %v657_v42  ;;  %v686_v62 = vadd.f32 %v928_v1, %v678_v60 }
 0x5d9   :  { %p1233_p9 = por %p1232_p8, %p1231_p7 }
 0x5da   :  { %v679_v61 = vmul.f32 %v927_v57, %v671_v59 }
 0x5db   :  { %p1234_p10 = pnand %p1233_p9, %p1227_p6 }
 0x5dc   :  { %v687_v63 = vadd.f32 %v928_v1, %v679_v61 }
 0x5de   :  { %v688_v0 = vpack.c.bf16 %v687_v63, %v686_v62 }
 0x5e0   :  { %1057 = vmatmul.mubr.bf16.vlgmr.msra.gmra.mxu1 %v688_v0 }
 0x6a0   :  { %v794_v3 = vpop.f32.mrf.mxu1 }
 0x6a1   :  { %v795_v4 = vadd.f32 %v929_v2, %v794_v3 }
 0x6a2   :  { %v1058_v5 = vpop.f32.mrf.mxu1 }
 0x6a3   :  { %v801_v6 = vmax.f32 %v795_v4, 0.0 }
 0x6a4   :  { %v797_v7 = vpop.f32.mrf.mxu1 }
 0x6a5   :  { %v798_v8 = vadd.f32 %v929_v2, %v797_v7  ;;  %803 = vadd.xlane.f32.xlu0 %v801_v6 }
 0x6a6   :  { %v1059_v9 = vpop.f32.mrf.mxu1 }
 0x6a7   :  { %v802_v10 = vmax.f32 %v798_v8, 0.0 }
 0x6a9   :  { %805 = vadd.xlane.f32.xlu1 %v802_v10 }
 0x72e   :  { %v804_v11 = vpop.xlane.xlu0 %803 }
 0x72f   :  { %v807_v12 = vmul.f32 0.0078125, %v804_v11 }
 0x731   :  { %v809_v13 = vsub.f32 %v801_v6, %v807_v12 }
 0x732   :  { %v806_v14 = vpop.xlane.xlu1 %805 }
 0x733   :  { %v808_v15 = vmul.f32 0.0078125, %v806_v14  ;;  %v811_v16 = vmul.f32 %v809_v13, %v809_v13 }
 0x735   :  { %v810_v17 = vsub.f32 %v802_v10, %v808_v15  ;;  %813 = vadd.xlane.f32.xlu0 %v811_v16 }
 0x737   :  { %v812_v18 = vmul.f32 %v810_v17, %v810_v17 }
 0x739   :  { %815 = vadd.xlane.f32.xlu1 %v812_v18 }
 0x7be   :  { %v814_v19 = vpop.xlane.xlu0 %813 }
 0x7bf   :  { %v817_v20 = vmul.f32 0.0078125, %v814_v19 }
 0x7c1   :  { %v819_v21 = vadd.f32 1e-06, %v817_v20 }
 0x7c2   :  { %v816_v22 = vpop.xlane.xlu1 %815 }
 0x7c3   :  { %1134 = vrsqrt.f32 %v819_v21  ;;  %v818_v25 = vmul.f32 0.0078125, %v816_v22 }
 0x7c5   :  { %v820_v26 = vadd.f32 1e-06, %v818_v25 }
 0x7c7   :  { %1136 = vrsqrt.f32 %v820_v26 }
 0x7d0   :  { %v1135_v27 = vpop.eup %1134 }
 0x7d1   :  { %v823_v28 = vmul.f32 %v1135_v27, %v809_v13 }
 0x7d3   :  { %v825_v29 = vmul.f32 %v927_v57, %v823_v28 }
 0x7d4   :  { %v1137_v30 = vpop.eup %1136 }
 0x7d5   :  { %v827_v32 = vadd.f32 %v928_v1, %v825_v29  ;;  %v824_v33 = vmul.f32 %v1137_v30, %v810_v17 }
 0x7d7   :  { %v836_v34 = vmul.f32 %v938_v31, %v827_v32  ;;  %v826_v35 = vmul.f32 %v927_v57, %v824_v33 }
 0x7d9   :  { %838 = vadd.xlane.f32.xlu0 %v836_v34  ;;  %v828_v36 = vadd.f32 %v928_v1, %v826_v35 }
 0x7db   :  { %v837_v37 = vmul.f32 %v938_v31, %v828_v36 }
 0x7dd   :  { %840 = vadd.xlane.f32.xlu1 %v837_v37 }
 0x862   :  { %v839_v39 = vpop.xlane.xlu0 %838 }
 0x863   :  { %v844_v40 = vadd.f32 %v843_v38, %v839_v39 }
 0x865   :  { %v939_v41 = vmul.f32 -1.442695, %v844_v40 }
 0x866   :  { %v841_v42 = vpop.xlane.xlu1 %840 }
 0x867   :  { %1138 = vpow2.f32 %v939_v41  ;;  %v845_v23 = vadd.f32 %v843_v38, %v841_v42 }
 0x869   :  { %v940_v43 = vmul.f32 -1.442695, %v845_v23 }
 0x86b   :  { %1140 = vpow2.f32 %v940_v43 }
 0x874   :  { %v1139_v24 = vpop.eup %1138 }
 0x875   :  { %v852_v44 = vadd.f32 1.0, %v1139_v24 }
 0x877   :  { %1142 = vrcp.f32 %v852_v44 }
 0x878   :  { %v1141_v45 = vpop.eup %1140 }
 0x879   :  { %v853_v46 = vadd.f32 1.0, %v1141_v45 }
 0x87b   :  { %1144 = vrcp.f32 %v853_v46 }
 0x884   :  { %v1143_v53 = vpop.eup %1142 }
 0x885   :  { %v865_v55 = vrot.slane %v1143_v53, %v864_v51 }
 0x888   :  { %v1145_v54 = vpop.eup %1144 }
 0x889   :  { %v870_v56 = vrot.slane %v1145_v54, %v869_v52 }
 0x88b   :  { %v872_v57 = vsel %vm871_vm3, %v870_v56, %v865_v55 }
 0x88c   :  { %875 = vst.msk [vmem:[#allocation11] sm:$0x1] %vm874_vm4, %v872_v57 }
 0x88d   :  { %1237 = shalt.err (!%p1234_p10)
}
 0x88e   :  { %885 = dma.vmem_to_hbm [thread:$0]  %s883_s8, 16, %s1413_s9, [#allocation5]  }
 0x88f   :  { %1252 = dma.done.wait [#allocation5], 16  }
 0x890   :  { %1253 = vsyncadd [#allocation5], 4294967280 }
 0x891   :  { %889 = vsyncpa [#allocation4], 1 }
 0x892   :  { %890 = vsyncpa [#allocation7], 1 }
 0x893   :  { %891 = vsyncpa [#allocation10], 1 }
 0x894   :  { %892 = vsyncpa [#allocation5], 1 }

// kernel: tpu_custom_call.1
= control target key start
LH: loop header
LB: loop body
LE: loop exit
PB: predicated region body
PF: predicated region fallthrough
CT: control target
= control target key end

     0   :  { %15 = vsyncpa [#allocation4], 0  ;;  %s1404_s0 = inlined_call_operand.hbm [shape: f32[2,8,128], index: 0, kind: input, shape index: {}]   ;;  %s1405_s1 = inlined_call_operand.hbm [shape: bf16[128,384], index: 1, kind: input, shape index: {}]   ;;  %s1406_s2 = inlined_call_operand.hbm [shape: bf16[128,128], index: 2, kind: input, shape index: {}]   ;;  %s1407_s3 = inlined_call_operand.hbm [shape: bf16[128,128], index: 3, kind: input, shape index: {}]   ;;  %s1408_s4 = inlined_call_operand.vmem [shape: f32[1,128], index: 4, kind: input, shape index: {}]   ;;  %s1409_s5 = inlined_call_operand.vmem [shape: f32[1,128], index: 5, kind: input, shape index: {}]   ;;  %s1410_s6 = inlined_call_operand.vmem [shape: f32[1,128], index: 6, kind: input, shape index: {}]   ;;  %s1411_s7 = inlined_call_operand.vmem [shape: f32[1,128], index: 7, kind: input, shape index: {}]   ;;  %s1412_s8 = inlined_call_operand.<no memory space> [shape: f32[1], index: 8, kind: input, shape index: {}]   ;;  %s1413_s9 = inlined_call_operand.hbm [shape: f32[1,16], index: 9, kind: output, shape index: {}]  }
   0x1   :  { %16 = vsyncpa [#allocation7], 0 }
   0x2   :  { %17 = vsyncpa [#allocation10], 0 }
   0x3   :  { %18 = vsyncpa [#allocation5], 0  ;;  %s1254_s30 = smov [#allocation6]  }
   0x4   :  { %s36_s10 = sshll.u32 %s1254_s30, 4  ;;  %s37_s10 = int_to_ptr.vmem [resolvable:$true] %s36_s10 }
   0x5   :  { %s1154_s11 = scalar_lea.vmem %s37_s10, 3072  ;;  %p1159_p1 = scmp.lt.s32.totalorder %s37_s10, %s37_s10 }
   0x6   :  { %p1155_p0 = scmp.ne.s32.totalorder %s37_s10, %s1154_s11  ;;  %p1160_p2 = scmp.lt.s32.totalorder %s1154_s11, %s1154_s11 }
   0x8   :  { %p1161_p3 = por %p1160_p2, %p1159_p1 }
   0xa   :  { %p1162_p4 = pnand %p1161_p3, %p1155_p0 }
   0xc   :  { %1165 = shalt.err (!%p1162_p4)
}
   0xd   :  { %s1255_s12 = smov 192   ;;  %s1256_s13 = smov 12  }
   0xe   :  { %42 = dma.hbm_to_vmem [thread:$0]  %s1405_s1, 3072, %s37_s10, [#allocation7], %s1255_s12, %s1255_s12, %s1256_s13  }
   0xf   :  { %s1257_s16 = smov [#allocation3]  }
  0x10   :  { %s24_s17 = sshll.u32 %s1257_s16, 4  ;;  %s25_s17 = int_to_ptr.vmem [resolvable:$true] %s24_s17 }
  0x11   :  { %s1174_s18 = scalar_lea.vmem %s25_s17, 256  ;;  %p1179_p6 = scmp.lt.s32.totalorder %s25_s17, %s25_s17 }
  0x12   :  { %p1175_p5 = scmp.ne.s32.totalorder %s25_s17, %s1174_s18  ;;  %p1180_p7 = scmp.lt.s32.totalorder %s1174_s18, %s1174_s18 }
  0x14   :  { %p1181_p8 = por %p1180_p7, %p1179_p6 }
  0x16   :  { %p1182_p9 = pnand %p1181_p8, %p1175_p5 }
  0x18   :  { %1185 = shalt.err (!%p1182_p9)
}
  0x19   :  { %s1258_s19 = smov 128   ;;  %s1259_s20 = smov 8  }
  0x1a   :  { %30 = dma.hbm_to_vmem [thread:$0]  %s1404_s0, 256, %s25_s17, [#allocation4], %s1258_s19, %s1258_s19, %s1259_s20  }
  0x1b   :  { %s1260_s23 = smov [#allocation8]  }
  0x1c   :  { %s48_s24 = sshll.u32 %s1260_s23, 4  ;;  %s49_s24 = int_to_ptr.vmem [resolvable:$true] %s48_s24 }
  0x1d   :  { %s1194_s1 = scalar_lea.vmem %s49_s24, 1024  ;;  %p1199_p11 = scmp.lt.s32.totalorder %s49_s24, %s49_s24 }
  0x1e   :  { %p1195_p10 = scmp.ne.s32.totalorder %s49_s24, %s1194_s1  ;;  %p1200_p12 = scmp.lt.s32.totalorder %s1194_s1, %s1194_s1 }
  0x20   :  { %p1201_p13 = por %p1200_p12, %p1199_p11 }
  0x22   :  { %p1202_p0 = pnand %p1201_p13, %p1195_p10 }
  0x24   :  { %1205 = shalt.err (!%p1202_p0)
}
  0x25   :  { %s1261_s25 = smov 64   ;;  %s1262_s26 = smov 4  }
  0x26   :  { %54 = dma.hbm_to_vmem [thread:$0]  %s1406_s2, 1024, %s49_s24, [#allocation7], %s1261_s25, %s1261_s25, %s1262_s26  }
  0x27   :  { %s1263_s29 = smov [#allocation9]  }
  0x28   :  { %s60_s30 = sshll.u32 %s1263_s29, 4  ;;  %s61_s30 = int_to_ptr.vmem [resolvable:$true] %s60_s30 }
  0x29   :  { %s1214_s0 = scalar_lea.vmem %s61_s30, 1024  ;;  %p1219_p2 = scmp.lt.s32.totalorder %s61_s30, %s61_s30 }
  0x2a   :  { %p1215_p1 = scmp.ne.s32.totalorder %s61_s30, %s1214_s0  ;;  %p1220_p3 = scmp.lt.s32.totalorder %s1214_s0, %s1214_s0 }
  0x2c   :  { %p1221_p4 = por %p1220_p3, %p1219_p2 }
  0x2e   :  { %p1222_p5 = pnand %p1221_p4, %p1215_p1 }
  0x30   :  { %1225 = shalt.err (!%p1222_p5)
}
  0x31   :  { %66 = dma.hbm_to_vmem [thread:$0]  %s1407_s3, 1024, %s61_s30, [#allocation10], %s1261_s25, %s1261_s25, %s1262_s26  }
  0x32   :  { %1246 = dma.done.wait [#allocation4], 256  }
  0x33   :  { %1247 = vsyncadd [#allocation4], 4294967040 }
  0x34   :  { %1248 = dma.done.wait [#allocation7], 4096  }
  0x35   :  { %1249 = vsyncadd [#allocation7], 4294963200 }
  0x36   :  { %1250 = dma.done.wait [#allocation10], 1024  }
  0x37   :  { %1251 = vsyncadd [#allocation10], 4294966272  ;;  %v1264_v0 = vmov 0   ;;  %v1265_v1 = vmov 0.0   ;;  %v1074_v2 = vld [vmem:[#allocation6 + $0xac] ss:$12 sps:$4 sm:$0xff]  }
  0x38   :  { %285 = vmatprep.mubr.bf16.mxu0 %v1264_v0  ;;  %976 = vmatprep.subr.bf16.mxu1 %v1265_v1  ;;  %v1076_v3 = vld [vmem:[#allocation6 + $0xa8] ss:$12 sps:$4 sm:$0xff]   ;;  %v1079_v5 = vld [vmem:[#allocation6 + $0x90] ss:$12 sps:$4 sm:$0xff]   ;;  %v1082_v7 = vld [vmem:[#allocation6 + $0x78] ss:$12 sps:$4 sm:$0xff]  }
  0x39   :  { %253 = vmatprep.subr.bf16.mxu0 %v1074_v2  ;;  %v1077_v4 = vld [vmem:[#allocation6 + $0x94] ss:$12 sps:$4 sm:$0xff]   ;;  %v1080_v6 = vld [vmem:[#allocation6 + $0x7c] ss:$12 sps:$4 sm:$0xff]   ;;  %v1083_v8 = vld [vmem:[#allocation6 + $0x64] ss:$12 sps:$4 sm:$0xff]  }
  0x3a   :  { %254 = vmatpush1.bf16.msra.mxu0 %v1076_v3  ;;  %v1085_v9 = vld [vmem:[#allocation6 + $0x60] ss:$12 sps:$4 sm:$0xff]   ;;  %v1098_v11 = vld [vmem:[#allocation6 + $0xb0] ss:$12 sps:$4 sm:$0xff]   ;;  %v1099_v12 = vld [vmem:[#allocation6 + $0x98] ss:$12 sps:$4 sm:$0xff]  }
  0x3b   :  { %255 = vmatprep.subr.bf16.mxu0 %v1077_v4  ;;  %v1086_v10 = vld [vmem:[#allocation6 + $0x4c] ss:$12 sps:$4 sm:$0xff]   ;;  %977 = vmatpush3.bf16.msra.mxu1 %v1098_v11  ;;  %v1088_v13 = vld [vmem:[#allocation6 + $0x48] ss:$12 sps:$4 sm:$0xff]   ;;  %v1091_v15 = vld [vmem:[#allocation6 + $0x30] ss:$12 sps:$4 sm:$0xff]  }
  0x3c   :  { %978 = vmatprep.subr.bf16.mxu1 %v1265_v1  ;;  %v1089_v14 = vld [vmem:[#allocation6 + $0x34] ss:$12 sps:$4 sm:$0xff]   ;;  %v1092_v17 = vld [vmem:[#allocation6 + $0x1c] ss:$12 sps:$4 sm:$0xff]   ;;  %v1094_v19 = vld [vmem:[#allocation6 + $0x18] ss:$12 sps:$4 sm:$0xff]  }
  0x3d   :  { %v1100_v16 = vld [vmem:[#allocation6 + $0x80] ss:$12 sps:$4 sm:$0xff]   ;;  %v1101_v18 = vld [vmem:[#allocation6 + $0x68] ss:$12 sps:$4 sm:$0xff]   ;;  %v1095_v20 = vld [vmem:[#allocation6 + $0x4] ss:$12 sps:$4 sm:$0xff]  }
  0x3e   :  { %256 = vmatpush1.bf16.msra.mxu0 %v1079_v5  ;;  %v1102_v21 = vld [vmem:[#allocation6 + $0x50] ss:$12 sps:$4 sm:$0xff]   ;;  %v1097_v22 = vld [vmem:[#allocation6] ss:$12 sps:$4 sm:$0xff]   ;;  %v1103_v26 = vld [vmem:[#allocation6 + $0x38] ss:$12 sps:$4 sm:$0xff]  }
  0x3f   :  { %257 = vmatprep.subr.bf16.mxu0 %v1080_v6  ;;  %979 = vmatpush3.bf16.msra.mxu1 %v1099_v12  ;;  %v1334_v23 = vld [vmem:[#allocation3] sm:$0xff]  ;;  %v1336_v24 = vld [vmem:[#allocation3 + $0x8] sm:$0xff]  ;;  %v1104_v27 = vld [vmem:[#allocation6 + $0x20] ss:$12 sps:$4 sm:$0xff]   ;;  %vm1266_vm0 = vmmov 0   ;;  %vm451_vm1 = vcmask 1043456  }
  0x40   :  { %980 = vmatprep.subr.bf16.mxu1 %v1265_v1  ;;  %v92_v25 = vpack.c.bf16 %v1336_v24, %v1334_v23  ;;  %v1105_v28 = vld [vmem:[#allocation6 + $0x8] ss:$12 sps:$4 sm:$0xff]   ;;  %992 = vmatprep.mubr.msk.bf16.mxu1 %vm1266_vm0, %v1265_v1  ;;  %vm423_vm2 = vcmask 64512   ;;  %v1106_v6 = vld [vmem:[#allocation8 + $0x38] sm:$0xff]   ;;  %vm871_vm3 = vcmask 130112   ;;  %vm874_vm4 = vcmask 122880  }
  0x41   :  { %v1108_v12 = vld [vmem:[#allocation8 + $0x28] sm:$0xff]  }
  0x42   :  { %258 = vmatpush1.bf16.msra.mxu0 %v1082_v7 }
  0x43   :  { %259 = vmatprep.subr.bf16.mxu0 %v1083_v8  ;;  %981 = vmatpush3.bf16.msra.mxu1 %v1100_v16  ;;  %v1112_v16 = vld [vmem:[#allocation8 + $0x8] sm:$0xff]  }
  0x44   :  { %982 = vmatprep.subr.bf16.mxu1 %v1265_v1 }
  0x46   :  { %260 = vmatpush1.bf16.msra.mxu0 %v1085_v9 }
  0x47   :  { %261 = vmatprep.subr.bf16.mxu0 %v1086_v10  ;;  %983 = vmatpush3.bf16.msra.mxu1 %v1101_v18  ;;  %v1107_v10 = vld [vmem:[#allocation8 + $0x30] sm:$0xff]  }
  0x48   :  { %984 = vmatprep.subr.bf16.mxu1 %v1265_v1 }
  0x4a   :  { %262 = vmatpush1.bf16.msra.mxu0 %v1088_v13  ;;  %v1109_v13 = vld [vmem:[#allocation8 + $0x20] sm:$0xff]  }
  0x4b   :  { %263 = vmatprep.subr.bf16.mxu0 %v1089_v14  ;;  %985 = vmatpush3.bf16.msra.mxu1 %v1102_v21  ;;  %v1110_v14 = vld [vmem:[#allocation8 + $0x18] sm:$0xff]  }
  0x4c   :  { %986 = vmatprep.subr.bf16.mxu1 %v1265_v1 }
  0x4e   :  { %264 = vmatpush1.bf16.msra.mxu0 %v1091_v15  ;;  %v1111_v15 = vld [vmem:[#allocation8 + $0x10] sm:$0xff]  }
  0x4f   :  { %265 = vmatprep.subr.bf16.mxu0 %v1092_v17  ;;  %987 = vmatpush3.bf16.msra.mxu1 %v1103_v26  ;;  %v1113_v17 = vld [vmem:[#allocation8] sm:$0xff]  }
  0x50   :  { %988 = vmatprep.subr.bf16.mxu1 %v1265_v1 }
  0x52   :  { %266 = vmatpush1.bf16.msra.mxu0 %v1094_v19 }
  0x53   :  { %267 = vmatprep.subr.bf16.mxu0 %v1095_v20  ;;  %989 = vmatpush3.bf16.msra.mxu1 %v1104_v27 }
  0x54   :  { %990 = vmatprep.subr.bf16.mxu1 %v1265_v1 }
  0x56   :  { %268 = vmatpush1.bf16.msra.mxu0 %v1097_v22 }
  0x57   :  { %996 = vmatprep.subr.bf16.mxu0 %v1265_v1  ;;  %991 = vmatpush3.bf16.msra.mxu1 %v1105_v28 }
  0x58   :  { %1002 = vmatprep.subr.bf16.mxu1 %v1265_v1 }
  0x59   :  { %286 = vmatmul.mubr.bf16.vlgmr.msra.gmra.mxu0 %v92_v25 }
  0x5a   :  { %998 = vmatprep.mubr.msk.bf16.mxu0 %vm1266_vm0, %v1265_v1  ;;  %993 = vmatmul.mubr.bf16.vlgmr.msra.gmra.mxu1 %v92_v25 }
  0x5b   :  { %1004 = vmatprep.mubr.msk.bf16.mxu1 %vm1266_vm0, %v1265_v1 }
 0x119   :  { %v287_v29 = vpop.f32.mrf.mxu0 }
 0x11a   :  { %v337_v30 = vpack.c.bf16 %v287_v29, %v287_v29  ;;  %v330_v37 = vpop.f32.mrf.mxu1 }
 0x11b   :  { %v289_v31 = vpop.f32.mrf.mxu0  ;;  %v341_v38 = vpack.c.bf16 %v330_v37, %v330_v37 }
 0x11c   :  { %997 = vmatpush3.bf16.xpose.msra.mxu0 %v337_v30  ;;  %v339_v34 = vpack.c.bf16 %v289_v31, %v289_v31  ;;  %v994_v39 = vpop.f32.mrf.mxu1 }
 0x11d   :  { %v291_v32 = vpop.f32.mrf.mxu0  ;;  %1008 = vmatprep.subr.bf16.mxu0 %v1265_v1  ;;  %v453_v40 = vsel %vm451_vm1, %v341_v38, 0 }
 0x11e   :  { %v338_v33 = vpack.c.bf16 %v291_v32, %v291_v32  ;;  %v333_v41 = vpop.f32.mrf.mxu1 }
 0x11f   :  { %v293_v35 = vpop.f32.mrf.mxu0  ;;  %v342_v42 = vpack.c.bf16 %v333_v41, %v333_v41 }
 0x120   :  { %1003 = vmatpush3.bf16.xpose.msra.mxu1 %v338_v33  ;;  %v340_v36 = vpack.c.bf16 %v293_v35, %v293_v35  ;;  %v995_v43 = vpop.f32.mrf.mxu1  ;;  %v1114_v35 = vld [vmem:[#allocation9 + $0x38] sm:$0xff]  }
 0x121   :  { %1014 = vmatprep.subr.bf16.mxu1 %v1265_v1  ;;  %v499_v44 = vsel %vm451_vm1, %v342_v42, 0  ;;  %v1115_v43 = vld [vmem:[#allocation9 + $0x30] sm:$0xff]  }
 0x123   :  { %999 = vmatmul.mubr.bf16.vlgmr.msra.gmra.mxu0 %v339_v34 }
 0x124   :  { %1010 = vmatprep.mubr.msk.bf16.mxu0 %vm1266_vm0, %v1265_v1  ;;  %1009 = vmatpush3.bf16.msra.mxu0 %v453_v40 }
 0x125   :  { %1020 = vmatprep.subr.bf16.mxu0 %v1265_v1 }
 0x127   :  { %1005 = vmatmul.mubr.bf16.vlgmr.msra.gmra.mxu1 %v340_v36 }
 0x128   :  { %1016 = vmatprep.mubr.msk.bf16.mxu1 %vm1266_vm0, %v1265_v1  ;;  %1015 = vmatpush3.bf16.msra.mxu1 %v499_v44  ;;  %v1117_v44 = vld [vmem:[#allocation9 + $0x20] sm:$0xff]  }
 0x129   :  { %1040 = vmatprep.subr.bf16.mxu1 %v1265_v1 }
 0x1e3   :  { %v377_v45 = vpop.f32.mrf.mxu0 }
 0x1e4   :  { %v424_v46 = vsel %vm423_vm2, %v377_v45, -inf }
 0x1e5   :  { %425 = vmax.xlane.f32.xlu0 %v424_v46  ;;  %v1000_v47 = vpop.f32.mrf.mxu0  ;;  %v1119_v46 = vld [vmem:[#allocation9 + $0x10] sm:$0xff]  }
 0x1e6   :  { %v1120_v47 = vld [vmem:[#allocation9 + $0x8] sm:$0xff]  }
 0x1e7   :  { %v380_v48 = vpop.f32.mrf.mxu0  ;;  %v417_v49 = vpop.f32.mrf.mxu1 }
 0x1e8   :  { %v427_v50 = vsel %vm423_vm2, %v417_v49, -inf  ;;  %v1121_v48 = vld [vmem:[#allocation9] sm:$0xff]  }
 0x1e9   :  { %v1001_v51 = vpop.f32.mrf.mxu0  ;;  %428 = vmax.xlane.f32.xlu0 %v427_v50  ;;  %v1006_v52 = vpop.f32.mrf.mxu1 }
 0x1eb   :  { %v420_v53 = vpop.f32.mrf.mxu1 }
 0x1ed   :  { %v1007_v54 = vpop.f32.mrf.mxu1 }
 0x26e   :  { %v426_v55 = vpop.xlane.xlu0 %425 }
 0x26f   :  { %v430_v56 = vsub.f32 %v377_v45, %v426_v55  ;;  %v1118_v45 = vld [vmem:[#allocation9 + $0x18] sm:$0xff]  }
 0x271   :  { %v432_v57 = vmul.f32 1.442695, %v430_v56 }
 0x272   :  { %v429_v58 = vpop.xlane.xlu0 %428 }
 0x273   :  { %1122 = vpow2.f32 %v432_v57  ;;  %v431_v59 = vsub.f32 %v417_v49, %v429_v58  ;;  %v927_v57 = vld [vmem:[%s1410_s6] ss:$0 sm:$0xff] }
 0x275   :  { %v434_v60 = vmul.f32 1.442695, %v431_v59 }
 0x277   :  { %1124 = vpow2.f32 %v434_v60 }
 0x280   :  { %v1123_v61 = vpop.eup %1122 }
 0x281   :  { %v436_v62 = vsel %vm423_vm2, %v1123_v61, 0.0 }
 0x282   :  { %437 = vadd.xlane.f32.xlu1 %v436_v62 }
 0x284   :  { %v1125_v63 = vpop.eup %1124 }
 0x285   :  { %v439_v0 = vsel %vm423_vm2, %v1125_v63, 0.0 }
 0x286   :  { %440 = vadd.xlane.f32.xlu1 %v439_v0 }
 0x30b   :  { %v438_v2 = vpop.xlane.xlu1 %437 }
 0x30c   :  { %1126 = vrcp.f32 %v438_v2  ;;  %v929_v2 = vld [vmem:[%s1408_s4] ss:$0 sm:$0xff] }
 0x30f   :  { %v441_v3 = vpop.xlane.xlu1 %440 }
 0x310   :  { %1128 = vrcp.f32 %v441_v3 }
 0x319   :  { %v1127_v4 = vpop.eup %1126 }
 0x31a   :  { %v444_v5 = vmul.f32 %v1127_v4, %v1123_v61 }
 0x31c   :  { %v446_v7 = vpack.c.bf16 %v444_v5, %v444_v5 }
 0x31d   :  { %v1129_v8 = vpop.eup %1128 }
 0x31e   :  { %1011 = vmatmul.mubr.msk.bf16.vlgmr.msra.gmra.mxu0 %vm423_vm2, %v446_v7  ;;  %v445_v9 = vmul.f32 %v1129_v8, %v1125_v63 }
 0x31f   :  { %1021 = vmatpush3.bf16.msra.mxu0 %v1106_v6  ;;  %1036 = vmatprep.mubr.msk.bf16.mxu0 %vm1266_vm0, %v1265_v1 }
 0x320   :  { %v447_v11 = vpack.c.bf16 %v445_v9, %v445_v9  ;;  %1022 = vmatprep.subr.bf16.mxu0 %v1265_v1 }
 0x322   :  { %1017 = vmatmul.mubr.msk.bf16.vlgmr.msra.gmra.mxu1 %vm423_vm2, %v447_v11 }
 0x323   :  { %1023 = vmatpush3.bf16.msra.mxu0 %v1107_v10  ;;  %1056 = vmatprep.mubr.msk.bf16.mxu1 %vm1266_vm0, %v1265_v1 }
 0x324   :  { %1024 = vmatprep.subr.bf16.mxu0 %v1265_v1  ;;  %1041 = vmatpush3.bf16.msra.mxu1 %v1114_v35 }
 0x325   :  { %1042 = vmatprep.subr.bf16.mxu1 %v1265_v1 }
 0x327   :  { %1025 = vmatpush3.bf16.msra.mxu0 %v1108_v12 }
 0x328   :  { %1026 = vmatprep.subr.bf16.mxu0 %v1265_v1  ;;  %1043 = vmatpush3.bf16.msra.mxu1 %v1115_v43 }
 0x329   :  { %1044 = vmatprep.subr.bf16.mxu1 %v1265_v1 }
 0x32b   :  { %1027 = vmatpush3.bf16.msra.mxu0 %v1109_v13 }
 0x32c   :  { %1028 = vmatprep.subr.bf16.mxu0 %v1265_v1 }
 0x32f   :  { %1029 = vmatpush3.bf16.msra.mxu0 %v1110_v14 }
 0x330   :  { %1030 = vmatprep.subr.bf16.mxu0 %v1265_v1 }
 0x333   :  { %1031 = vmatpush3.bf16.msra.mxu0 %v1111_v15 }
 0x334   :  { %1032 = vmatprep.subr.bf16.mxu0 %v1265_v1 }
 0x337   :  { %1033 = vmatpush3.bf16.msra.mxu0 %v1112_v16 }
 0x338   :  { %1034 = vmatprep.subr.bf16.mxu0 %v1265_v1 }
 0x33b   :  { %1035 = vmatpush3.bf16.msra.mxu0 %v1113_v17 }
 0x3de   :  { %v489_v18 = vpop.f32.mrf.mxu0 }
 0x3e0   :  { %v1012_v19 = vpop.f32.mrf.mxu0 }
 0x3e2   :  { %v492_v20 = vpop.f32.mrf.mxu0  ;;  %v535_v21 = vpop.f32.mrf.mxu1 }
 0x3e3   :  { %v541_v22 = vpack.c.bf16 %v535_v21, %v489_v18 }
 0x3e4   :  { %v1013_v25 = vpop.f32.mrf.mxu0  ;;  %v1018_v26 = vpop.f32.mrf.mxu1 }
 0x3e5   :  { %1037 = vmatmul.mubr.bf16.vlgmr.msra.gmra.mxu0 %v541_v22 }
 0x3e6   :  { %v538_v27 = vpop.f32.mrf.mxu1 }
 0x3e8   :  { %v1019_v28 = vpop.f32.mrf.mxu1 }
 0x4a5   :  { %v640_v29 = vpop.f32.mrf.mxu0 }
 0x4a6   :  { %v641_v30 = vadd.f32 %v640_v29, %v1334_v23 }
 0x4a7   :  { %v1038_v31 = vpop.f32.mrf.mxu0 }
 0x4a8   :  { %649 = vadd.xlane.f32.xlu0 %v641_v30  ;;  %v938_v31 = vld [vmem:[%s1409_s5] ss:$0 sm:$0xff]  ;;  %s1267_s5 = smov [#allocation11]  }
 0x4a9   :  { %v643_v32 = vpop.f32.mrf.mxu0 }
 0x4aa   :  { %v644_v33 = vadd.f32 %v643_v32, %v1336_v24  ;;  %v1116_v24 = vld [vmem:[#allocation9 + $0x28] sm:$0xff]  }
 0x4ab   :  { %v1039_v34 = vpop.f32.mrf.mxu0  ;;  %1045 = vmatpush3.bf16.msra.mxu1 %v1116_v24 }
 0x4ac   :  { %651 = vadd.xlane.f32.xlu1 %v644_v33  ;;  %1046 = vmatprep.subr.bf16.mxu1 %v1265_v1 }
 0x4af   :  { %1047 = vmatpush3.bf16.msra.mxu1 %v1117_v44 }
 0x4b0   :  { %1048 = vmatprep.subr.bf16.mxu1 %v1265_v1 }
 0x4b3   :  { %1049 = vmatpush3.bf16.msra.mxu1 %v1118_v45 }
 0x4b4   :  { %1050 = vmatprep.subr.bf16.mxu1 %v1265_v1 }
 0x4b7   :  { %1051 = vmatpush3.bf16.msra.mxu1 %v1119_v46 }
 0x4b8   :  { %1052 = vmatprep.subr.bf16.mxu1 %v1265_v1 }
 0x4bb   :  { %1053 = vmatpush3.bf16.msra.mxu1 %v1120_v47  ;;  %v860_v47 = vlaneseq }
 0x4bc   :  { %1054 = vmatprep.subr.bf16.mxu1 %v1265_v1  ;;  %v928_v1 = vld [vmem:[%s1411_s7] ss:$0 sm:$0xff] }
 0x4bf   :  { %1055 = vmatpush3.bf16.msra.mxu1 %v1121_v48  ;;  %v861_v48 = vand.u32 127, %v860_v47 }
 0x531   :  { %v650_v36 = vpop.xlane.xlu0 %649 }
 0x532   :  { %v654_v37 = vmul.f32 0.0078125, %v650_v36 }
 0x534   :  { %v656_v38 = vsub.f32 %v641_v30, %v654_v37 }
 0x535   :  { %v652_v39 = vpop.xlane.xlu1 %651 }
 0x536   :  { %v655_v40 = vmul.f32 0.0078125, %v652_v39  ;;  %v658_v41 = vmul.f32 %v656_v38, %v656_v38 }
 0x538   :  { %v657_v42 = vsub.f32 %v644_v33, %v655_v40  ;;  %660 = vadd.xlane.f32.xlu0 %v658_v41 }
 0x53a   :  { %v659_v23 = vmul.f32 %v657_v42, %v657_v42 }
 0x53c   :  { %662 = vadd.xlane.f32.xlu1 %v659_v23 }
 0x5c1   :  { %v661_v49 = vpop.xlane.xlu0 %660 }
 0x5c2   :  { %v664_v50 = vmul.f32 0.0078125, %v661_v49  ;;  %v863_v49 = vshrl.u32 %v860_v47, 7 }
 0x5c4   :  { %v666_v51 = vadd.f32 1e-06, %v664_v50  ;;  %v866_v50 = vadd.s32 4294967288, %v861_v48 }
 0x5c5   :  { %v663_v52 = vpop.xlane.xlu1 %662 }
 0x5c6   :  { %1130 = vrsqrt.f32 %v666_v51  ;;  %v665_v53 = vmul.f32 0.0078125, %v663_v52  ;;  %v864_v51 = vsub.s32 %v861_v48, %v863_v49  ;;  %v869_v52 = vsub.s32 %v866_v50, %v863_v49 }
 0x5c8   :  { %v667_v54 = vadd.f32 1e-06, %v665_v53 }
 0x5ca   :  { %1132 = vrsqrt.f32 %v667_v54 }
 0x5d3   :  { %v1131_v55 = vpop.eup %1130 }
 0x5d4   :  { %v670_v56 = vmul.f32 %v1131_v55, %v656_v38  ;;  %v843_v38 = vstv %s1412_s8  ;;  %s882_s8 = sshll.u32 %s1267_s5, 4  ;;  %s883_s8 = int_to_ptr.vmem [resolvable:$true] %s882_s8 }
 0x5d5   :  { %s1226_s17 = scalar_lea.vmem %s883_s8, 16  ;;  %s1230_s18 = scalar_lea.vmem %s883_s8, 32 }
 0x5d6   :  { %v678_v60 = vmul.f32 %v927_v57, %v670_v56  ;;  %p1227_p6 = scmp.ne.s32.totalorder %s883_s8, %s1226_s17  ;;  %p1231_p7 = scmp.lt.s32.totalorder %s883_s8, %s883_s8 }
 0x5d7   :  { %v1133_v58 = vpop.eup %1132  ;;  %p1232_p8 = scmp.lt.s32.totalorder %s1230_s18, %s1226_s17 }
 0x5d8   :  { %v671_v59 = vmul.f32 %v1133_v58, %v657_v42  ;;  %v686_v62 = vadd.f32 %v928_v1, %v678_v60 }
 0x5d9   :  { %p1233_p9 = por %p1232_p8, %p1231_p7 }
 0x5da   :  { %v679_v61 = vmul.f32 %v927_v57, %v671_v59 }
 0x5db   :  { %p1234_p10 = pnand %p1233_p9, %p1227_p6 }
 0x5dc   :  { %v687_v63 = vadd.f32 %v928_v1, %v679_v61 }
 0x5de   :  { %v688_v0 = vpack.c.bf16 %v687_v63, %v686_v62 }
 0x5e0   :  { %1057 = vmatmul.mubr.bf16.vlgmr.msra.gmra.mxu1 %v688_v0 }
 0x6a0   :  { %v794_v3 = vpop.f32.mrf.mxu1 }
 0x6a1   :  { %v795_v4 = vadd.f32 %v929_v2, %v794_v3 }
 0x6a2   :  { %v1058_v5 = vpop.f32.mrf.mxu1 }
 0x6a3   :  { %v801_v6 = vmax.f32 %v795_v4, 0.0 }
 0x6a4   :  { %v797_v7 = vpop.f32.mrf.mxu1 }
 0x6a5   :  { %v798_v8 = vadd.f32 %v929_v2, %v797_v7  ;;  %803 = vadd.xlane.f32.xlu0 %v801_v6 }
 0x6a6   :  { %v1059_v9 = vpop.f32.mrf.mxu1 }
 0x6a7   :  { %v802_v10 = vmax.f32 %v798_v8, 0.0 }
 0x6a9   :  { %805 = vadd.xlane.f32.xlu1 %v802_v10 }
 0x72e   :  { %v804_v11 = vpop.xlane.xlu0 %803 }
 0x72f   :  { %v807_v12 = vmul.f32 0.0078125, %v804_v11 }
 0x731   :  { %v809_v13 = vsub.f32 %v801_v6, %v807_v12 }
 0x732   :  { %v806_v14 = vpop.xlane.xlu1 %805 }
 0x733   :  { %v808_v15 = vmul.f32 0.0078125, %v806_v14  ;;  %v811_v16 = vmul.f32 %v809_v13, %v809_v13 }
 0x735   :  { %v810_v17 = vsub.f32 %v802_v10, %v808_v15  ;;  %813 = vadd.xlane.f32.xlu0 %v811_v16 }
 0x737   :  { %v812_v18 = vmul.f32 %v810_v17, %v810_v17 }
 0x739   :  { %815 = vadd.xlane.f32.xlu1 %v812_v18 }
 0x7be   :  { %v814_v19 = vpop.xlane.xlu0 %813 }
 0x7bf   :  { %v817_v20 = vmul.f32 0.0078125, %v814_v19 }
 0x7c1   :  { %v819_v21 = vadd.f32 1e-06, %v817_v20 }
 0x7c2   :  { %v816_v22 = vpop.xlane.xlu1 %815 }
 0x7c3   :  { %1134 = vrsqrt.f32 %v819_v21  ;;  %v818_v25 = vmul.f32 0.0078125, %v816_v22 }
 0x7c5   :  { %v820_v26 = vadd.f32 1e-06, %v818_v25 }
 0x7c7   :  { %1136 = vrsqrt.f32 %v820_v26 }
 0x7d0   :  { %v1135_v27 = vpop.eup %1134 }
 0x7d1   :  { %v823_v28 = vmul.f32 %v1135_v27, %v809_v13 }
 0x7d3   :  { %v825_v29 = vmul.f32 %v927_v57, %v823_v28 }
 0x7d4   :  { %v1137_v30 = vpop.eup %1136 }
 0x7d5   :  { %v827_v32 = vadd.f32 %v928_v1, %v825_v29  ;;  %v824_v33 = vmul.f32 %v1137_v30, %v810_v17 }
 0x7d7   :  { %v836_v34 = vmul.f32 %v938_v31, %v827_v32  ;;  %v826_v35 = vmul.f32 %v927_v57, %v824_v33 }
 0x7d9   :  { %838 = vadd.xlane.f32.xlu0 %v836_v34  ;;  %v828_v36 = vadd.f32 %v928_v1, %v826_v35 }
 0x7db   :  { %v837_v37 = vmul.f32 %v938_v31, %v828_v36 }
 0x7dd   :  { %840 = vadd.xlane.f32.xlu1 %v837_v37 }
 0x862   :  { %v839_v39 = vpop.xlane.xlu0 %838 }
 0x863   :  { %v844_v40 = vadd.f32 %v843_v38, %v839_v39 }
 0x865   :  { %v939_v41 = vmul.f32 -1.442695, %v844_v40 }
 0x866   :  { %v841_v42 = vpop.xlane.xlu1 %840 }
 0x867   :  { %1138 = vpow2.f32 %v939_v41  ;;  %v845_v23 = vadd.f32 %v843_v38, %v841_v42 }
 0x869   :  { %v940_v43 = vmul.f32 -1.442695, %v845_v23 }
 0x86b   :  { %1140 = vpow2.f32 %v940_v43 }
 0x874   :  { %v1139_v24 = vpop.eup %1138 }
 0x875   :  { %v852_v44 = vadd.f32 1.0, %v1139_v24 }
 0x877   :  { %1142 = vrcp.f32 %v852_v44 }
 0x878   :  { %v1141_v45 = vpop.eup %1140 }
 0x879   :  { %v853_v46 = vadd.f32 1.0, %v1141_v45 }
 0x87b   :  { %1144 = vrcp.f32 %v853_v46 }
 0x884   :  { %v1143_v53 = vpop.eup %1142 }
 0x885   :  { %v865_v55 = vrot.slane %v1143_v53, %v864_v51 }
 0x888   :  { %v1145_v54 = vpop.eup %1144 }
 0x889   :  { %v870_v56 = vrot.slane %v1145_v54, %v869_v52 }
 0x88b   :  { %v872_v57 = vsel %vm871_vm3, %v870_v56, %v865_v55 }
 0x88c   :  { %875 = vst.msk [vmem:[#allocation11] sm:$0x1] %vm874_vm4, %v872_v57 }
 0x88d   :  { %1237 = shalt.err (!%p1234_p10)
}
 0x88e   :  { %885 = dma.vmem_to_hbm [thread:$0]  %s883_s8, 16, %s1413_s9, [#allocation5]  }
 0x88f   :  { %1252 = dma.done.wait [#allocation5], 16  }
 0x890   :  { %1253 = vsyncadd [#allocation5], 4294967280 }
 0x891   :  { %889 = vsyncpa [#allocation4], 1 }
 0x892   :  { %890 = vsyncpa [#allocation7], 1 }
 0x893   :  { %891 = vsyncpa [#allocation10], 1 }
 0x894   :  { %892 = vsyncpa [#allocation5], 1 }

</bundles_post_ra>
